<compile_context>
chip_gen: v7x
topology: tpu7x:2x2x1
jax: 0.10.0
libtpu: 0.0.40
codegen_flags: <defaults>
</compile_context>

<pallas_src>
import jax
import jax.numpy as jnp
from jax import lax
from jax.experimental import pallas as pl
from jax.experimental.pallas import tpu as pltpu

EPS = 1e-5


# --------------------------------------------------------------------------
# Sub-pixel tap table for ConvTranspose2d(k=stride+2, stride, padding=1).
# For output position oy = stride*q + r the contributing kernel taps are
# kh = ((-r) mod stride) + stride*a (kh < k), reading padded input row
# q + (r + kh)//stride.
# --------------------------------------------------------------------------
def _taps(stride, ksize):
    table = []
    for r in range(stride):
        first = (-r) % stride
        table.append([((r + kh) // stride, kh) for kh in range(first, ksize, stride)])
    return table


def _pick_tile_h(h, max_rows=256):
    """Largest divisor of h that is <= max_rows (whole image rows as fallback)."""
    best = 1
    for d in range(1, min(h, max_rows) + 1):
        if h % d == 0:
            best = d
    if best < 8 and best != h:
        best = h
    return best


# --------------------------------------------------------------------------
# Kernels (closures over the static tap plan / tile height).
#   pass 1: recompute y per sub-pixel, emit per-(block, sub-pixel) sum / sumsq
#   pass 2: recompute y, apply folded BN affine + ReLU, store densely
# --------------------------------------------------------------------------
def _make_kernels(plan, th):
    def accum(x_ref, b_ref, plan_r):
        acc = None
        for (fi, jy) in plan_r:                      # static python loop (<= k taps)
            lhs = x_ref[0, jy:jy + th, :]            # (TH, (W+2)*Cin) 2-D slice
            c = jnp.dot(lhs, b_ref[fi], preferred_element_type=jnp.float32)
            acc = c if acc is None else acc + c
        return acc                                   # (TH, W*Cout)

    def stats_kernel(x_ref, b_ref, stats_ref):
        for r, plan_r in enumerate(plan):
            acc = accum(x_ref, b_ref, plan_r)
            stats_ref[0, r, 0:1, :] = jnp.sum(acc, axis=0, keepdims=True)
            stats_ref[0, r, 1:2, :] = jnp.sum(acc * acc, axis=0, keepdims=True)

    def out_kernel(x_ref, b_ref, scale_ref, shift_ref, o_ref):
        for r, plan_r in enumerate(plan):
            acc = accum(x_ref, b_ref, plan_r)
            o_ref[0, r, :, :] = jnp.maximum(
                acc * scale_ref[...] + shift_ref[...], 0.0)

    return stats_kernel, out_kernel


def conv_transpose2d_module(x_nchw, weight, gamma, beta, stride):
    """ConvTranspose2d (no bias) -> BatchNorm2d (batch stats) -> ReLU.

    x_nchw : (N, Cin, H, W) f32
    weight : (Cin, Cout, KH, KW) f32 (PyTorch ConvTranspose2d layout)
    gamma, beta : (Cout,) f32
    """
    N, Cin, H, W = x_nchw.shape
    Cin_w, Cout, KH, KW = weight.shape
    assert Cin == Cin_w and KH == stride + 2 and KW == stride + 2

    Ho, Wo = H * stride, W * stride
    s2 = stride * stride
    KK = (W + 2) * Cin                 # contraction width (padded cols x Cin)
    NN = W * Cout                      # lane width of compute / output tiles
    TH = _pick_tile_h(H)
    num_h = H // TH
    NB = N * num_h
    f32 = jnp.float32

    # ---- input prep: NHWC, pad by 1, fold (col, cin) into lanes, halo'd row blocks ----
    x = jnp.transpose(x_nchw, (0, 2, 3, 1)).astype(f32)          # (N, H, W, Cin)
    xp = jnp.pad(x, ((0, 0), (1, 1), (1, 1), (0, 0)))            # (N, H+2, W+2, Cin)
    xp2 = xp.reshape(N, H + 2, KK)
    blocks = [xp2[:, bh * TH: bh * TH + TH + 2, :] for bh in range(num_h)]
    xblk = jnp.stack(blocks, axis=1).reshape(NB, TH + 2, KK)     # ~(1+2/TH)x dup only

    # ---- banded weights: one ((W+2)*Cin, W*Cout) matrix per (sub-pixel, row-tap) ----
    # ConvTranspose -> regular-conv weight: flip spatially, channels last.
    wflip = jnp.transpose(weight[:, :, ::-1, ::-1], (2, 3, 0, 1)).astype(f32)
    taps = _taps(stride, KH)
    w_idx = jnp.arange(W)
    rows_base = w_idx[:, None] * Cin + jnp.arange(Cin)[None, :]  # (W, Cin)
    cols = w_idx[:, None] * Cout + jnp.arange(Cout)[None, :]     # (W, Cout)
    b_list, plan, fi = [], [], 0
    for ry in range(stride):
        for rx in range(stride):
            entries = []
            for (jy, khy) in taps[ry]:
                bm = jnp.zeros((KK, NN), f32)
                for (jx, kwx) in taps[rx]:
                    rows = rows_base + jx * Cin
                    bm = bm.at[rows[:, :, None], cols[:, None, :]].add(
                        wflip[khy, kwx][None, :, :])
                b_list.append(bm)
                entries.append((fi, jy))
                fi += 1
            plan.append(entries)                                 # r = ry*stride + rx
    bmat = jnp.stack(b_list, axis=0)                             # (n_taps, KK, NN)
    n_taps = bmat.shape[0]

    stats_kernel, out_kernel = _make_kernels(plan, TH)
    grid = (NB,)
    x_spec = pl.BlockSpec((1, TH + 2, KK), lambda i: (i, 0, 0))
    b_spec = pl.BlockSpec((n_taps, KK, NN), lambda i: (0, 0, 0))  # resident in VMEM
    mm_flops = 2 * NB * n_taps * TH * KK * NN

    # ---- pass 1: matmul (recompute) + per-block per-channel sum / sumsq partials ----
    stats = pl.pallas_call(
        stats_kernel,
        out_shape=jax.ShapeDtypeStruct((NB, s2, 2, NN), f32),
        grid=grid,
        in_specs=[x_spec, b_spec],
        out_specs=pl.BlockSpec((1, s2, 2, NN), lambda i: (i, 0, 0, 0)),
        compiler_params=pltpu.CompilerParams(dimension_semantics=("parallel",)),
        cost_estimate=pl.CostEstimate(
            flops=mm_flops, transcendentals=0,
            bytes_accessed=4 * (xblk.size + bmat.size + NB * s2 * 2 * NN)),
    )(xblk, bmat)

    # ---- fold global batch stats into per-channel scale / shift ----
    count = jnp.float32(N * Ho * Wo)
    st = stats.reshape(NB, s2, 2, W, Cout)
    ssum = jnp.sum(st[:, :, 0], axis=(0, 1, 2))                  # (Cout,)
    ssq = jnp.sum(st[:, :, 1], axis=(0, 1, 2))
    mean = ssum / count
    var = jnp.maximum(ssq / count - mean * mean, 0.0)
    inv_std = lax.rsqrt(var + EPS)
    scale = gamma.astype(f32) * inv_std
    shift = beta.astype(f32) - mean * scale
    scale_t = jnp.tile(scale, W).reshape(1, NN)                  # lane index = w*Cout + c
    shift_t = jnp.tile(shift, W).reshape(1, NN)

    # ---- pass 2: fused matmul + BN affine + ReLU (no y round trip, dense stores) ----
    out = pl.pallas_call(
        out_kernel,
        out_shape=jax.ShapeDtypeStruct((NB, s2, TH, NN), f32),
        grid=grid,
        in_specs=[x_spec, b_spec,
                  pl.BlockSpec((1, NN), lambda i: (0, 0)),
                  pl.BlockSpec((1, NN), lambda i: (0, 0))],
        out_specs=pl.BlockSpec((1, s2, TH, NN), lambda i: (i, 0, 0, 0)),
        compiler_params=pltpu.CompilerParams(dimension_semantics=("parallel",)),
        cost_estimate=pl.CostEstimate(
            flops=mm_flops, transcendentals=0,
            bytes_accessed=4 * (xblk.size + bmat.size + NB * s2 * TH * NN)),
    )(xblk, bmat, scale_t, shift_t)

    # ---- interleave sub-pixels back to NCHW ----
    out = out.reshape(N, num_h, stride, stride, TH, W, Cout)     # (n,bh,ry,rx,t,w,c)
    out = jnp.transpose(out, (0, 6, 1, 4, 2, 5, 3))              # (n,c,bh,t,ry,w,rx)
    return out.reshape(N, Cout, Ho, Wo)


def _reference(x_nchw, weight, gamma, beta, stride):
    """Pure-JAX reference (lax conv with lhs_dilation == ConvTranspose2d) + BN + ReLU."""
    KH = weight.shape[2]
    pad = KH - 2
    w_conv = jnp.transpose(weight[:, :, ::-1, ::-1], (1, 0, 2, 3))   # OIHW
    y = lax.conv_general_dilated(
        x_nchw, w_conv, window_strides=(1, 1),
        padding=[(pad, pad), (pad, pad)],
        lhs_dilation=(stride, stride),
        dimension_numbers=('NCHW', 'OIHW', 'NCHW'))
    mean = jnp.mean(y, axis=(0, 2, 3), keepdims=True)
    var = jnp.var(y, axis=(0, 2, 3), keepdims=True)
    y = (y - mean) * lax.rsqrt(var + EPS)
    y = y * gamma.reshape(1, -1, 1, 1) + beta.reshape(1, -1, 1, 1)
    return jnp.maximum(y, 0.0)


if __name__ == "__main__":
    # Module config: in_channels=4, out_channels=8, stride=2 -> kernel_size=4
    in_channels, out_channels, stride = 4, 8, 2
    N, H, W = 2, 16, 16

    key = jax.random.PRNGKey(0)
    kx, kw = jax.random.split(key)
    x = jax.random.normal(kx, (N, in_channels, H, W), dtype=jnp.float32)
    # ConvTranspose2d weight layout: (in_channels, out_channels, kH, kW)
    weight = 0.1 * jax.random.normal(
        kw, (in_channels, out_channels, stride + 2, stride + 2), dtype=jnp.float32)
    # BatchNorm2d default init: weight(gamma)=1, bias(beta)=0
    gamma = jnp.ones((out_channels,), jnp.float32)
    beta = jnp.zeros((out_channels,), jnp.float32)

    fwd = jax.jit(conv_transpose2d_module, static_argnames="stride")
    out = fwd(x, weight, gamma, beta, stride=stride)
    out = jax.block_until_ready(out)
    assert out.shape == (N, out_channels, H * stride, W * stride), out.shape

    ref = _reference(x, weight, gamma, beta, stride)
    err = float(jnp.max(jnp.abs(out - ref)))
    assert jnp.allclose(out, ref, atol=1e-3, rtol=1e-3), err

    print("KERNEL_OK")
</pallas_src>

<mosaic_0001>
module attributes {stable_mosaic.version = 11 : i64} {
  func.func private @main(%arg0: i32) attributes {dimension_semantics = [#tpu.dimension_semantics<core_parallel>], iteration_bounds = array<i64: 2>, tpu.core_type = #tpu.core_type<sc_scalar_subcore>, window_params = []} {
    return
  }
}

module attributes {stable_mosaic.version = 11 : i64} {
  func.func private @main(%arg0: i32) attributes {dimension_semantics = [#tpu.dimension_semantics<core_parallel>], iteration_bounds = array<i64: 2>, tpu.core_type = #tpu.core_type<sc_scalar_subcore>, window_params = []} {
    return
  }
}

module attributes {stable_mosaic.version = 11 : i64} {
  func.func @stats_kernel(%arg0: i32, %arg1: memref<1x18x72xf32, #tpu.memory_space<vmem>>, %arg2: memref<8x72x128xf32, #tpu.memory_space<vmem>>, %arg3: memref<1x4x2x128xf32, #tpu.memory_space<vmem>>) attributes {dimension_semantics = [#tpu.dimension_semantics<parallel>], iteration_bounds = array<i64: 2>, scalar_prefetch = 0 : i64, scratch_operands = 0 : i64, tpu.core_type = #tpu.core_type<tc>, window_params = [{transform_indices = @transform_0, window_bounds = array<i64: 1, 18, 72>}, {pipeline_mode = #tpu.pipeline_mode<synchronous>, transform_indices = @transform_1, window_bounds = array<i64: 8, 72, 128>}, {transform_indices = @transform_2, window_bounds = array<i64: 1, 4, 2, 128>}]} {
    %c0 = arith.constant 0 : index
    %c0_0 = arith.constant 0 : index
    %c0_1 = arith.constant 0 : index
    %0 = vector.load %arg1[%c0, %c0_0, %c0_1] : memref<1x18x72xf32, #tpu.memory_space<vmem>>, vector<1x16x72xf32>
    %1 = vector.shape_cast %0 : vector<1x16x72xf32> to vector<16x72xf32>
    %c0_2 = arith.constant 0 : index
    %c0_3 = arith.constant 0 : index
    %c0_4 = arith.constant 0 : index
    %2 = vector.load %arg2[%c0_2, %c0_3, %c0_4] : memref<8x72x128xf32, #tpu.memory_space<vmem>>, vector<1x72x128xf32>
    %3 = vector.shape_cast %2 : vector<1x72x128xf32> to vector<72x128xf32>
    %cst = arith.constant dense<0.000000e+00> : vector<16x128xf32>
    %4 = tpu.matmul %1, %3, %cst {dimension_numbers = #tpu.dot_dimension_numbers<[1], [0], [0], [1], [0, 0, 1, 1], [], []>} : vector<16x72xf32>, vector<72x128xf32>, vector<16x128xf32> -> vector<16x128xf32>
    %c0_5 = arith.constant 0 : index
    %c1 = arith.constant 1 : index
    %c0_6 = arith.constant 0 : index
    %5 = vector.load %arg1[%c0_5, %c1, %c0_6] : memref<1x18x72xf32, #tpu.memory_space<vmem>>, vector<1x16x72xf32>
    %6 = vector.shape_cast %5 : vector<1x16x72xf32> to vector<16x72xf32>
    %c1_7 = arith.constant 1 : index
    %c0_8 = arith.constant 0 : index
    %c0_9 = arith.constant 0 : index
    %7 = vector.load %arg2[%c1_7, %c0_8, %c0_9] : memref<8x72x128xf32, #tpu.memory_space<vmem>>, vector<1x72x128xf32>
    %8 = vector.shape_cast %7 : vector<1x72x128xf32> to vector<72x128xf32>
    %cst_10 = arith.constant dense<0.000000e+00> : vector<16x128xf32>
    %9 = tpu.matmul %6, %8, %cst_10 {dimension_numbers = #tpu.dot_dimension_numbers<[1], [0], [0], [1], [0, 0, 1, 1], [], []>} : vector<16x72xf32>, vector<72x128xf32>, vector<16x128xf32> -> vector<16x128xf32>
    %10 = arith.addf %4, %9 : vector<16x128xf32>
    %cst_11 = arith.constant dense<0.000000e+00> : vector<128xf32>
    %11 = vector.multi_reduction <add>, %10, %cst_11 [0] : vector<16x128xf32> to vector<128xf32>
    %12 = vector.shape_cast %11 : vector<128xf32> to vector<1x128xf32>
    %c0_12 = arith.constant 0 : index
    %c0_13 = arith.constant 0 : index
    %c0_14 = arith.constant 0 : index
    %c0_15 = arith.constant 0 : index
    %13 = vector.load %arg3[%c0_12, %c0_13, %c0_14, %c0_15] : memref<1x4x2x128xf32, #tpu.memory_space<vmem>>, vector<1x1x1x128xf32>
    %14 = vector.shape_cast %13 : vector<1x1x1x128xf32> to vector<1x128xf32>
    %15 = vector.shape_cast %12 : vector<1x128xf32> to vector<1x1x1x128xf32>
    tpu.vector_store %arg3[%c0_12, %c0_13, %c0_14, %c0_15], %15 {strides = array<i32>} : memref<1x4x2x128xf32, #tpu.memory_space<vmem>>, vector<1x1x1x128xf32>,
    %16 = arith.mulf %10, %10 : vector<16x128xf32>
    %cst_16 = arith.constant dense<0.000000e+00> : vector<128xf32>
    %17 = vector.multi_reduction <add>, %16, %cst_16 [0] : vector<16x128xf32> to vector<128xf32>
    %18 = vector.shape_cast %17 : vector<128xf32> to vector<1x128xf32>
    %c0_17 = arith.constant 0 : index
    %c0_18 = arith.constant 0 : index
    %c1_19 = arith.constant 1 : index
    %c0_20 = arith.constant 0 : index
    %19 = vector.load %arg3[%c0_17, %c0_18, %c1_19, %c0_20] : memref<1x4x2x128xf32, #tpu.memory_space<vmem>>, vector<1x1x1x128xf32>
    %20 = vector.shape_cast %19 : vector<1x1x1x128xf32> to vector<1x128xf32>
    %21 = vector.shape_cast %18 : vector<1x128xf32> to vector<1x1x1x128xf32>
    tpu.vector_store %arg3[%c0_17, %c0_18, %c1_19, %c0_20], %21 {strides = array<i32>} : memref<1x4x2x128xf32, #tpu.memory_space<vmem>>, vector<1x1x1x128xf32>,
    %c0_21 = arith.constant 0 : index
    %c0_22 = arith.constant 0 : index
    %c0_23 = arith.constant 0 : index
    %22 = vector.load %arg1[%c0_21, %c0_22, %c0_23] : memref<1x18x72xf32, #tpu.memory_space<vmem>>, vector<1x16x72xf32>
    %23 = vector.shape_cast %22 : vector<1x16x72xf32> to vector<16x72xf32>
    %c2 = arith.constant 2 : index
    %c0_24 = arith.constant 0 : index
    %c0_25 = arith.constant 0 : index
    %24 = vector.load %arg2[%c2, %c0_24, %c0_25] : memref<8x72x128xf32, #tpu.memory_space<vmem>>, vector<1x72x128xf32>
    %25 = vector.shape_cast %24 : vector<1x72x128xf32> to vector<72x128xf32>
    %cst_26 = arith.constant dense<0.000000e+00> : vector<16x128xf32>
    %26 = tpu.matmul %23, %25, %cst_26 {dimension_numbers = #tpu.dot_dimension_numbers<[1], [0], [0], [1], [0, 0, 1, 1], [], []>} : vector<16x72xf32>, vector<72x128xf32>, vector<16x128xf32> -> vector<16x128xf32>
    %c0_27 = arith.constant 0 : index
    %c1_28 = arith.constant 1 : index
    %c0_29 = arith.constant 0 : index
    %27 = vector.load %arg1[%c0_27, %c1_28, %c0_29] : memref<1x18x72xf32, #tpu.memory_space<vmem>>, vector<1x16x72xf32>
    %28 = vector.shape_cast %27 : vector<1x16x72xf32> to vector<16x72xf32>
    %c3 = arith.constant 3 : index
    %c0_30 = arith.constant 0 : index
    %c0_31 = arith.constant 0 : index
    %29 = vector.load %arg2[%c3, %c0_30, %c0_31] : memref<8x72x128xf32, #tpu.memory_space<vmem>>, vector<1x72x128xf32>
    %30 = vector.shape_cast %29 : vector<1x72x128xf32> to vector<72x128xf32>
    %cst_32 = arith.constant dense<0.000000e+00> : vector<16x128xf32>
    %31 = tpu.matmul %28, %30, %cst_32 {dimension_numbers = #tpu.dot_dimension_numbers<[1], [0], [0], [1], [0, 0, 1, 1], [], []>} : vector<16x72xf32>, vector<72x128xf32>, vector<16x128xf32> -> vector<16x128xf32>
    %32 = arith.addf %26, %31 : vector<16x128xf32>
    %cst_33 = arith.constant dense<0.000000e+00> : vector<128xf32>
    %33 = vector.multi_reduction <add>, %32, %cst_33 [0] : vector<16x128xf32> to vector<128xf32>
    %34 = vector.shape_cast %33 : vector<128xf32> to vector<1x128xf32>
    %c0_34 = arith.constant 0 : index
    %c1_35 = arith.constant 1 : index
    %c0_36 = arith.constant 0 : index
    %c0_37 = arith.constant 0 : index
    %35 = vector.load %arg3[%c0_34, %c1_35, %c0_36, %c0_37] : memref<1x4x2x128xf32, #tpu.memory_space<vmem>>, vector<1x1x1x128xf32>
    %36 = vector.shape_cast %35 : vector<1x1x1x128xf32> to vector<1x128xf32>
    %37 = vector.shape_cast %34 : vector<1x128xf32> to vector<1x1x1x128xf32>
    tpu.vector_store %arg3[%c0_34, %c1_35, %c0_36, %c0_37], %37 {strides = array<i32>} : memref<1x4x2x128xf32, #tpu.memory_space<vmem>>, vector<1x1x1x128xf32>,
    %38 = arith.mulf %32, %32 : vector<16x128xf32>
    %cst_38 = arith.constant dense<0.000000e+00> : vector<128xf32>
    %39 = vector.multi_reduction <add>, %38, %cst_38 [0] : vector<16x128xf32> to vector<128xf32>
    %40 = vector.shape_cast %39 : vector<128xf32> to vector<1x128xf32>
    %c0_39 = arith.constant 0 : index
    %c1_40 = arith.constant 1 : index
    %c1_41 = arith.constant 1 : index
    %c0_42 = arith.constant 0 : index
    %41 = vector.load %arg3[%c0_39, %c1_40, %c1_41, %c0_42] : memref<1x4x2x128xf32, #tpu.memory_space<vmem>>, vector<1x1x1x128xf32>
    %42 = vector.shape_cast %41 : vector<1x1x1x128xf32> to vector<1x128xf32>
    %43 = vector.shape_cast %40 : vector<1x128xf32> to vector<1x1x1x128xf32>
    tpu.vector_store %arg3[%c0_39, %c1_40, %c1_41, %c0_42], %43 {strides = array<i32>} : memref<1x4x2x128xf32, #tpu.memory_space<vmem>>, vector<1x1x1x128xf32>,
    %c0_43 = arith.constant 0 : index
    %c1_44 = arith.constant 1 : index
    %c0_45 = arith.constant 0 : index
    %44 = vector.load %arg1[%c0_43, %c1_44, %c0_45] : memref<1x18x72xf32, #tpu.memory_space<vmem>>, vector<1x16x72xf32>
    %45 = vector.shape_cast %44 : vector<1x16x72xf32> to vector<16x72xf32>
    %c4 = arith.constant 4 : index
    %c0_46 = arith.constant 0 : index
    %c0_47 = arith.constant 0 : index
    %46 = vector.load %arg2[%c4, %c0_46, %c0_47] : memref<8x72x128xf32, #tpu.memory_space<vmem>>, vector<1x72x128xf32>
    %47 = vector.shape_cast %46 : vector<1x72x128xf32> to vector<72x128xf32>
    %cst_48 = arith.constant dense<0.000000e+00> : vector<16x128xf32>
    %48 = tpu.matmul %45, %47, %cst_48 {dimension_numbers = #tpu.dot_dimension_numbers<[1], [0], [0], [1], [0, 0, 1, 1], [], []>} : vector<16x72xf32>, vector<72x128xf32>, vector<16x128xf32> -> vector<16x128xf32>
    %c0_49 = arith.constant 0 : index
    %c2_50 = arith.constant 2 : index
    %c0_51 = arith.constant 0 : index
    %49 = vector.load %arg1[%c0_49, %c2_50, %c0_51] : memref<1x18x72xf32, #tpu.memory_space<vmem>>, vector<1x16x72xf32>
    %50 = vector.shape_cast %49 : vector<1x16x72xf32> to vector<16x72xf32>
    %c5 = arith.constant 5 : index
    %c0_52 = arith.constant 0 : index
    %c0_53 = arith.constant 0 : index
    %51 = vector.load %arg2[%c5, %c0_52, %c0_53] : memref<8x72x128xf32, #tpu.memory_space<vmem>>, vector<1x72x128xf32>
    %52 = vector.shape_cast %51 : vector<1x72x128xf32> to vector<72x128xf32>
    %cst_54 = arith.constant dense<0.000000e+00> : vector<16x128xf32>
    %53 = tpu.matmul %50, %52, %cst_54 {dimension_numbers = #tpu.dot_dimension_numbers<[1], [0], [0], [1], [0, 0, 1, 1], [], []>} : vector<16x72xf32>, vector<72x128xf32>, vector<16x128xf32> -> vector<16x128xf32>
    %54 = arith.addf %48, %53 : vector<16x128xf32>
    %cst_55 = arith.constant dense<0.000000e+00> : vector<128xf32>
    %55 = vector.multi_reduction <add>, %54, %cst_55 [0] : vector<16x128xf32> to vector<128xf32>
    %56 = vector.shape_cast %55 : vector<128xf32> to vector<1x128xf32>
    %c0_56 = arith.constant 0 : index
    %c2_57 = arith.constant 2 : index
    %c0_58 = arith.constant 0 : index
    %c0_59 = arith.constant 0 : index
    %57 = vector.load %arg3[%c0_56, %c2_57, %c0_58, %c0_59] : memref<1x4x2x128xf32, #tpu.memory_space<vmem>>, vector<1x1x1x128xf32>
    %58 = vector.shape_cast %57 : vector<1x1x1x128xf32> to vector<1x128xf32>
    %59 = vector.shape_cast %56 : vector<1x128xf32> to vector<1x1x1x128xf32>
    tpu.vector_store %arg3[%c0_56, %c2_57, %c0_58, %c0_59], %59 {strides = array<i32>} : memref<1x4x2x128xf32, #tpu.memory_space<vmem>>, vector<1x1x1x128xf32>,
    %60 = arith.mulf %54, %54 : vector<16x128xf32>
    %cst_60 = arith.constant dense<0.000000e+00> : vector<128xf32>
    %61 = vector.multi_reduction <add>, %60, %cst_60 [0] : vector<16x128xf32> to vector<128xf32>
    %62 = vector.shape_cast %61 : vector<128xf32> to vector<1x128xf32>
    %c0_61 = arith.constant 0 : index
    %c2_62 = arith.constant 2 : index
    %c1_63 = arith.constant 1 : index
    %c0_64 = arith.constant 0 : index
    %63 = vector.load %arg3[%c0_61, %c2_62, %c1_63, %c0_64] : memref<1x4x2x128xf32, #tpu.memory_space<vmem>>, vector<1x1x1x128xf32>
    %64 = vector.shape_cast %63 : vector<1x1x1x128xf32> to vector<1x128xf32>
    %65 = vector.shape_cast %62 : vector<1x128xf32> to vector<1x1x1x128xf32>
    tpu.vector_store %arg3[%c0_61, %c2_62, %c1_63, %c0_64], %65 {strides = array<i32>} : memref<1x4x2x128xf32, #tpu.memory_space<vmem>>, vector<1x1x1x128xf32>,
    %c0_65 = arith.constant 0 : index
    %c1_66 = arith.constant 1 : index
    %c0_67 = arith.constant 0 : index
    %66 = vector.load %arg1[%c0_65, %c1_66, %c0_67] : memref<1x18x72xf32, #tpu.memory_space<vmem>>, vector<1x16x72xf32>
    %67 = vector.shape_cast %66 : vector<1x16x72xf32> to vector<16x72xf32>
    %c6 = arith.constant 6 : index
    %c0_68 = arith.constant 0 : index
    %c0_69 = arith.constant 0 : index
    %68 = vector.load %arg2[%c6, %c0_68, %c0_69] : memref<8x72x128xf32, #tpu.memory_space<vmem>>, vector<1x72x128xf32>
    %69 = vector.shape_cast %68 : vector<1x72x128xf32> to vector<72x128xf32>
    %cst_70 = arith.constant dense<0.000000e+00> : vector<16x128xf32>
    %70 = tpu.matmul %67, %69, %cst_70 {dimension_numbers = #tpu.dot_dimension_numbers<[1], [0], [0], [1], [0, 0, 1, 1], [], []>} : vector<16x72xf32>, vector<72x128xf32>, vector<16x128xf32> -> vector<16x128xf32>
    %c0_71 = arith.constant 0 : index
    %c2_72 = arith.constant 2 : index
    %c0_73 = arith.constant 0 : index
    %71 = vector.load %arg1[%c0_71, %c2_72, %c0_73] : memref<1x18x72xf32, #tpu.memory_space<vmem>>, vector<1x16x72xf32>
    %72 = vector.shape_cast %71 : vector<1x16x72xf32> to vector<16x72xf32>
    %c7 = arith.constant 7 : index
    %c0_74 = arith.constant 0 : index
    %c0_75 = arith.constant 0 : index
    %73 = vector.load %arg2[%c7, %c0_74, %c0_75] : memref<8x72x128xf32, #tpu.memory_space<vmem>>, vector<1x72x128xf32>
    %74 = vector.shape_cast %73 : vector<1x72x128xf32> to vector<72x128xf32>
    %cst_76 = arith.constant dense<0.000000e+00> : vector<16x128xf32>
    %75 = tpu.matmul %72, %74, %cst_76 {dimension_numbers = #tpu.dot_dimension_numbers<[1], [0], [0], [1], [0, 0, 1, 1], [], []>} : vector<16x72xf32>, vector<72x128xf32>, vector<16x128xf32> -> vector<16x128xf32>
    %76 = arith.addf %70, %75 : vector<16x128xf32>
    %cst_77 = arith.constant dense<0.000000e+00> : vector<128xf32>
    %77 = vector.multi_reduction <add>, %76, %cst_77 [0] : vector<16x128xf32> to vector<128xf32>
    %78 = vector.shape_cast %77 : vector<128xf32> to vector<1x128xf32>
    %c0_78 = arith.constant 0 : index
    %c3_79 = arith.constant 3 : index
    %c0_80 = arith.constant 0 : index
    %c0_81 = arith.constant 0 : index
    %79 = vector.load %arg3[%c0_78, %c3_79, %c0_80, %c0_81] : memref<1x4x2x128xf32, #tpu.memory_space<vmem>>, vector<1x1x1x128xf32>
    %80 = vector.shape_cast %79 : vector<1x1x1x128xf32> to vector<1x128xf32>
    %81 = vector.shape_cast %78 : vector<1x128xf32> to vector<1x1x1x128xf32>
    tpu.vector_store %arg3[%c0_78, %c3_79, %c0_80, %c0_81], %81 {strides = array<i32>} : memref<1x4x2x128xf32, #tpu.memory_space<vmem>>, vector<1x1x1x128xf32>,
    %82 = arith.mulf %76, %76 : vector<16x128xf32>
    %cst_82 = arith.constant dense<0.000000e+00> : vector<128xf32>
    %83 = vector.multi_reduction <add>, %82, %cst_82 [0] : vector<16x128xf32> to vector<128xf32>
    %84 = vector.shape_cast %83 : vector<128xf32> to vector<1x128xf32>
    %c0_83 = arith.constant 0 : index
    %c3_84 = arith.constant 3 : index
    %c1_85 = arith.constant 1 : index
    %c0_86 = arith.constant 0 : index
    %85 = vector.load %arg3[%c0_83, %c3_84, %c1_85, %c0_86] : memref<1x4x2x128xf32, #tpu.memory_space<vmem>>, vector<1x1x1x128xf32>
    %86 = vector.shape_cast %85 : vector<1x1x1x128xf32> to vector<1x128xf32>
    %87 = vector.shape_cast %84 : vector<1x128xf32> to vector<1x1x1x128xf32>
    tpu.vector_store %arg3[%c0_83, %c3_84, %c1_85, %c0_86], %87 {strides = array<i32>} : memref<1x4x2x128xf32, #tpu.memory_space<vmem>>, vector<1x1x1x128xf32>,
    return
  }
  func.func @transform_0(%arg0: i32) -> (i32, i32, i32) {
    %c0_i32 = arith.constant 0 : i32
    %c0_i32_0 = arith.constant 0 : i32
    %c0_i32_1 = arith.constant 0 : i32
    return %arg0, %c0_i32, %c0_i32_0 : i32, i32, i32
  }
  func.func @transform_1(%arg0: i32) -> (i32, i32, i32) {
    %c0_i32 = arith.constant 0 : i32
    %c0_i32_0 = arith.constant 0 : i32
    %c0_i32_1 = arith.constant 0 : i32
    %c0_i32_2 = arith.constant 0 : i32
    return %c0_i32, %c0_i32_0, %c0_i32_1 : i32, i32, i32
  }
  func.func @transform_2(%arg0: i32) -> (i32, i32, i32, i32) {
    %c0_i32 = arith.constant 0 : i32
    %c0_i32_0 = arith.constant 0 : i32
    %c0_i32_1 = arith.constant 0 : i32
    %c0_i32_2 = arith.constant 0 : i32
    return %arg0, %c0_i32, %c0_i32_0, %c0_i32_1 : i32, i32, i32, i32
  }
}

module attributes {stable_mosaic.version = 11 : i64} {
  func.func @out_kernel(%arg0: i32, %arg1: memref<1x18x72xf32, #tpu.memory_space<vmem>>, %arg2: memref<8x72x128xf32, #tpu.memory_space<vmem>>, %arg3: memref<1x128xf32, #tpu.memory_space<vmem>>, %arg4: memref<1x128xf32, #tpu.memory_space<vmem>>, %arg5: memref<1x4x16x128xf32, #tpu.memory_space<vmem>>) attributes {dimension_semantics = [#tpu.dimension_semantics<parallel>], iteration_bounds = array<i64: 2>, scalar_prefetch = 0 : i64, scratch_operands = 0 : i64, tpu.core_type = #tpu.core_type<tc>, window_params = [{transform_indices = @transform_0, window_bounds = array<i64: 1, 18, 72>}, {pipeline_mode = #tpu.pipeline_mode<synchronous>, transform_indices = @transform_1, window_bounds = array<i64: 8, 72, 128>}, {pipeline_mode = #tpu.pipeline_mode<synchronous>, transform_indices = @transform_2, window_bounds = array<i64: 1, 128>}, {pipeline_mode = #tpu.pipeline_mode<synchronous>, transform_indices = @transform_3, window_bounds = array<i64: 1, 128>}, {transform_indices = @transform_4, window_bounds = array<i64: 1, 4, 16, 128>}]} {
    %c0 = arith.constant 0 : index
    %c0_0 = arith.constant 0 : index
    %c0_1 = arith.constant 0 : index
    %0 = vector.load %arg1[%c0, %c0_0, %c0_1] : memref<1x18x72xf32, #tpu.memory_space<vmem>>, vector<1x16x72xf32>
    %1 = vector.shape_cast %0 : vector<1x16x72xf32> to vector<16x72xf32>
    %c0_2 = arith.constant 0 : index
    %c0_3 = arith.constant 0 : index
    %c0_4 = arith.constant 0 : index
    %2 = vector.load %arg2[%c0_2, %c0_3, %c0_4] : memref<8x72x128xf32, #tpu.memory_space<vmem>>, vector<1x72x128xf32>
    %3 = vector.shape_cast %2 : vector<1x72x128xf32> to vector<72x128xf32>
    %cst = arith.constant dense<0.000000e+00> : vector<16x128xf32>
    %4 = tpu.matmul %1, %3, %cst {dimension_numbers = #tpu.dot_dimension_numbers<[1], [0], [0], [1], [0, 0, 1, 1], [], []>} : vector<16x72xf32>, vector<72x128xf32>, vector<16x128xf32> -> vector<16x128xf32>
    %c0_5 = arith.constant 0 : index
    %c1 = arith.constant 1 : index
    %c0_6 = arith.constant 0 : index
    %5 = vector.load %arg1[%c0_5, %c1, %c0_6] : memref<1x18x72xf32, #tpu.memory_space<vmem>>, vector<1x16x72xf32>
    %6 = vector.shape_cast %5 : vector<1x16x72xf32> to vector<16x72xf32>
    %c1_7 = arith.constant 1 : index
    %c0_8 = arith.constant 0 : index
    %c0_9 = arith.constant 0 : index
    %7 = vector.load %arg2[%c1_7, %c0_8, %c0_9] : memref<8x72x128xf32, #tpu.memory_space<vmem>>, vector<1x72x128xf32>
    %8 = vector.shape_cast %7 : vector<1x72x128xf32> to vector<72x128xf32>
    %cst_10 = arith.constant dense<0.000000e+00> : vector<16x128xf32>
    %9 = tpu.matmul %6, %8, %cst_10 {dimension_numbers = #tpu.dot_dimension_numbers<[1], [0], [0], [1], [0, 0, 1, 1], [], []>} : vector<16x72xf32>, vector<72x128xf32>, vector<16x128xf32> -> vector<16x128xf32>
    %10 = arith.addf %4, %9 : vector<16x128xf32>
    %c0_11 = arith.constant 0 : index
    %c0_12 = arith.constant 0 : index
    %11 = vector.load %arg3[%c0_11, %c0_12] : memref<1x128xf32, #tpu.memory_space<vmem>>, vector<1x128xf32>
    %12 = vector.broadcast %11 : vector<1x128xf32> to vector<16x128xf32>
    %13 = arith.mulf %10, %12 : vector<16x128xf32>
    %c0_13 = arith.constant 0 : index
    %c0_14 = arith.constant 0 : index
    %14 = vector.load %arg4[%c0_13, %c0_14] : memref<1x128xf32, #tpu.memory_space<vmem>>, vector<1x128xf32>
    %15 = vector.broadcast %14 : vector<1x128xf32> to vector<16x128xf32>
    %16 = arith.addf %13, %15 : vector<16x128xf32>
    %cst_15 = arith.constant 0.000000e+00 : f32
    %17 = vector.broadcast %cst_15 : f32 to vector<16x128xf32>
    %18 = arith.maximumf %16, %17 : vector<16x128xf32>
    %c0_16 = arith.constant 0 : index
    %c0_17 = arith.constant 0 : index
    %c0_18 = arith.constant 0 : index
    %c0_19 = arith.constant 0 : index
    %19 = vector.load %arg5[%c0_16, %c0_17, %c0_18, %c0_19] : memref<1x4x16x128xf32, #tpu.memory_space<vmem>>, vector<1x1x16x128xf32>
    %20 = vector.shape_cast %19 : vector<1x1x16x128xf32> to vector<16x128xf32>
    %21 = vector.shape_cast %18 : vector<16x128xf32> to vector<1x1x16x128xf32>
    tpu.vector_store %arg5[%c0_16, %c0_17, %c0_18, %c0_19], %21 {strides = array<i32>} : memref<1x4x16x128xf32, #tpu.memory_space<vmem>>, vector<1x1x16x128xf32>,
    %c0_20 = arith.constant 0 : index
    %c0_21 = arith.constant 0 : index
    %c0_22 = arith.constant 0 : index
    %22 = vector.load %arg1[%c0_20, %c0_21, %c0_22] : memref<1x18x72xf32, #tpu.memory_space<vmem>>, vector<1x16x72xf32>
    %23 = vector.shape_cast %22 : vector<1x16x72xf32> to vector<16x72xf32>
    %c2 = arith.constant 2 : index
    %c0_23 = arith.constant 0 : index
    %c0_24 = arith.constant 0 : index
    %24 = vector.load %arg2[%c2, %c0_23, %c0_24] : memref<8x72x128xf32, #tpu.memory_space<vmem>>, vector<1x72x128xf32>
    %25 = vector.shape_cast %24 : vector<1x72x128xf32> to vector<72x128xf32>
    %cst_25 = arith.constant dense<0.000000e+00> : vector<16x128xf32>
    %26 = tpu.matmul %23, %25, %cst_25 {dimension_numbers = #tpu.dot_dimension_numbers<[1], [0], [0], [1], [0, 0, 1, 1], [], []>} : vector<16x72xf32>, vector<72x128xf32>, vector<16x128xf32> -> vector<16x128xf32>
    %c0_26 = arith.constant 0 : index
    %c1_27 = arith.constant 1 : index
    %c0_28 = arith.constant 0 : index
    %27 = vector.load %arg1[%c0_26, %c1_27, %c0_28] : memref<1x18x72xf32, #tpu.memory_space<vmem>>, vector<1x16x72xf32>
    %28 = vector.shape_cast %27 : vector<1x16x72xf32> to vector<16x72xf32>
    %c3 = arith.constant 3 : index
    %c0_29 = arith.constant 0 : index
    %c0_30 = arith.constant 0 : index
    %29 = vector.load %arg2[%c3, %c0_29, %c0_30] : memref<8x72x128xf32, #tpu.memory_space<vmem>>, vector<1x72x128xf32>
    %30 = vector.shape_cast %29 : vector<1x72x128xf32> to vector<72x128xf32>
    %cst_31 = arith.constant dense<0.000000e+00> : vector<16x128xf32>
    %31 = tpu.matmul %28, %30, %cst_31 {dimension_numbers = #tpu.dot_dimension_numbers<[1], [0], [0], [1], [0, 0, 1, 1], [], []>} : vector<16x72xf32>, vector<72x128xf32>, vector<16x128xf32> -> vector<16x128xf32>
    %32 = arith.addf %26, %31 : vector<16x128xf32>
    %c0_32 = arith.constant 0 : index
    %c0_33 = arith.constant 0 : index
    %33 = vector.load %arg3[%c0_32, %c0_33] : memref<1x128xf32, #tpu.memory_space<vmem>>, vector<1x128xf32>
    %34 = vector.broadcast %33 : vector<1x128xf32> to vector<16x128xf32>
    %35 = arith.mulf %32, %34 : vector<16x128xf32>
    %c0_34 = arith.constant 0 : index
    %c0_35 = arith.constant 0 : index
    %36 = vector.load %arg4[%c0_34, %c0_35] : memref<1x128xf32, #tpu.memory_space<vmem>>, vector<1x128xf32>
    %37 = vector.broadcast %36 : vector<1x128xf32> to vector<16x128xf32>
    %38 = arith.addf %35, %37 : vector<16x128xf32>
    %cst_36 = arith.constant 0.000000e+00 : f32
    %39 = vector.broadcast %cst_36 : f32 to vector<16x128xf32>
    %40 = arith.maximumf %38, %39 : vector<16x128xf32>
    %c0_37 = arith.constant 0 : index
    %c1_38 = arith.constant 1 : index
    %c0_39 = arith.constant 0 : index
    %c0_40 = arith.constant 0 : index
    %41 = vector.load %arg5[%c0_37, %c1_38, %c0_39, %c0_40] : memref<1x4x16x128xf32, #tpu.memory_space<vmem>>, vector<1x1x16x128xf32>
    %42 = vector.shape_cast %41 : vector<1x1x16x128xf32> to vector<16x128xf32>
    %43 = vector.shape_cast %40 : vector<16x128xf32> to vector<1x1x16x128xf32>
    tpu.vector_store %arg5[%c0_37, %c1_38, %c0_39, %c0_40], %43 {strides = array<i32>} : memref<1x4x16x128xf32, #tpu.memory_space<vmem>>, vector<1x1x16x128xf32>,
    %c0_41 = arith.constant 0 : index
    %c1_42 = arith.constant 1 : index
    %c0_43 = arith.constant 0 : index
    %44 = vector.load %arg1[%c0_41, %c1_42, %c0_43] : memref<1x18x72xf32, #tpu.memory_space<vmem>>, vector<1x16x72xf32>
    %45 = vector.shape_cast %44 : vector<1x16x72xf32> to vector<16x72xf32>
    %c4 = arith.constant 4 : index
    %c0_44 = arith.constant 0 : index
    %c0_45 = arith.constant 0 : index
    %46 = vector.load %arg2[%c4, %c0_44, %c0_45] : memref<8x72x128xf32, #tpu.memory_space<vmem>>, vector<1x72x128xf32>
    %47 = vector.shape_cast %46 : vector<1x72x128xf32> to vector<72x128xf32>
    %cst_46 = arith.constant dense<0.000000e+00> : vector<16x128xf32>
    %48 = tpu.matmul %45, %47, %cst_46 {dimension_numbers = #tpu.dot_dimension_numbers<[1], [0], [0], [1], [0, 0, 1, 1], [], []>} : vector<16x72xf32>, vector<72x128xf32>, vector<16x128xf32> -> vector<16x128xf32>
    %c0_47 = arith.constant 0 : index
    %c2_48 = arith.constant 2 : index
    %c0_49 = arith.constant 0 : index
    %49 = vector.load %arg1[%c0_47, %c2_48, %c0_49] : memref<1x18x72xf32, #tpu.memory_space<vmem>>, vector<1x16x72xf32>
    %50 = vector.shape_cast %49 : vector<1x16x72xf32> to vector<16x72xf32>
    %c5 = arith.constant 5 : index
    %c0_50 = arith.constant 0 : index
    %c0_51 = arith.constant 0 : index
    %51 = vector.load %arg2[%c5, %c0_50, %c0_51] : memref<8x72x128xf32, #tpu.memory_space<vmem>>, vector<1x72x128xf32>
    %52 = vector.shape_cast %51 : vector<1x72x128xf32> to vector<72x128xf32>
    %cst_52 = arith.constant dense<0.000000e+00> : vector<16x128xf32>
    %53 = tpu.matmul %50, %52, %cst_52 {dimension_numbers = #tpu.dot_dimension_numbers<[1], [0], [0], [1], [0, 0, 1, 1], [], []>} : vector<16x72xf32>, vector<72x128xf32>, vector<16x128xf32> -> vector<16x128xf32>
    %54 = arith.addf %48, %53 : vector<16x128xf32>
    %c0_53 = arith.constant 0 : index
    %c0_54 = arith.constant 0 : index
    %55 = vector.load %arg3[%c0_53, %c0_54] : memref<1x128xf32, #tpu.memory_space<vmem>>, vector<1x128xf32>
    %56 = vector.broadcast %55 : vector<1x128xf32> to vector<16x128xf32>
    %57 = arith.mulf %54, %56 : vector<16x128xf32>
    %c0_55 = arith.constant 0 : index
    %c0_56 = arith.constant 0 : index
    %58 = vector.load %arg4[%c0_55, %c0_56] : memref<1x128xf32, #tpu.memory_space<vmem>>, vector<1x128xf32>
    %59 = vector.broadcast %58 : vector<1x128xf32> to vector<16x128xf32>
    %60 = arith.addf %57, %59 : vector<16x128xf32>
    %cst_57 = arith.constant 0.000000e+00 : f32
    %61 = vector.broadcast %cst_57 : f32 to vector<16x128xf32>
    %62 = arith.maximumf %60, %61 : vector<16x128xf32>
    %c0_58 = arith.constant 0 : index
    %c2_59 = arith.constant 2 : index
    %c0_60 = arith.constant 0 : index
    %c0_61 = arith.constant 0 : index
    %63 = vector.load %arg5[%c0_58, %c2_59, %c0_60, %c0_61] : memref<1x4x16x128xf32, #tpu.memory_space<vmem>>, vector<1x1x16x128xf32>
    %64 = vector.shape_cast %63 : vector<1x1x16x128xf32> to vector<16x128xf32>
    %65 = vector.shape_cast %62 : vector<16x128xf32> to vector<1x1x16x128xf32>
    tpu.vector_store %arg5[%c0_58, %c2_59, %c0_60, %c0_61], %65 {strides = array<i32>} : memref<1x4x16x128xf32, #tpu.memory_space<vmem>>, vector<1x1x16x128xf32>,
    %c0_62 = arith.constant 0 : index
    %c1_63 = arith.constant 1 : index
    %c0_64 = arith.constant 0 : index
    %66 = vector.load %arg1[%c0_62, %c1_63, %c0_64] : memref<1x18x72xf32, #tpu.memory_space<vmem>>, vector<1x16x72xf32>
    %67 = vector.shape_cast %66 : vector<1x16x72xf32> to vector<16x72xf32>
    %c6 = arith.constant 6 : index
    %c0_65 = arith.constant 0 : index
    %c0_66 = arith.constant 0 : index
    %68 = vector.load %arg2[%c6, %c0_65, %c0_66] : memref<8x72x128xf32, #tpu.memory_space<vmem>>, vector<1x72x128xf32>
    %69 = vector.shape_cast %68 : vector<1x72x128xf32> to vector<72x128xf32>
    %cst_67 = arith.constant dense<0.000000e+00> : vector<16x128xf32>
    %70 = tpu.matmul %67, %69, %cst_67 {dimension_numbers = #tpu.dot_dimension_numbers<[1], [0], [0], [1], [0, 0, 1, 1], [], []>} : vector<16x72xf32>, vector<72x128xf32>, vector<16x128xf32> -> vector<16x128xf32>
    %c0_68 = arith.constant 0 : index
    %c2_69 = arith.constant 2 : index
    %c0_70 = arith.constant 0 : index
    %71 = vector.load %arg1[%c0_68, %c2_69, %c0_70] : memref<1x18x72xf32, #tpu.memory_space<vmem>>, vector<1x16x72xf32>
    %72 = vector.shape_cast %71 : vector<1x16x72xf32> to vector<16x72xf32>
    %c7 = arith.constant 7 : index
    %c0_71 = arith.constant 0 : index
    %c0_72 = arith.constant 0 : index
    %73 = vector.load %arg2[%c7, %c0_71, %c0_72] : memref<8x72x128xf32, #tpu.memory_space<vmem>>, vector<1x72x128xf32>
    %74 = vector.shape_cast %73 : vector<1x72x128xf32> to vector<72x128xf32>
    %cst_73 = arith.constant dense<0.000000e+00> : vector<16x128xf32>
    %75 = tpu.matmul %72, %74, %cst_73 {dimension_numbers = #tpu.dot_dimension_numbers<[1], [0], [0], [1], [0, 0, 1, 1], [], []>} : vector<16x72xf32>, vector<72x128xf32>, vector<16x128xf32> -> vector<16x128xf32>
    %76 = arith.addf %70, %75 : vector<16x128xf32>
    %c0_74 = arith.constant 0 : index
    %c0_75 = arith.constant 0 : index
    %77 = vector.load %arg3[%c0_74, %c0_75] : memref<1x128xf32, #tpu.memory_space<vmem>>, vector<1x128xf32>
    %78 = vector.broadcast %77 : vector<1x128xf32> to vector<16x128xf32>
    %79 = arith.mulf %76, %78 : vector<16x128xf32>
    %c0_76 = arith.constant 0 : index
    %c0_77 = arith.constant 0 : index
    %80 = vector.load %arg4[%c0_76, %c0_77] : memref<1x128xf32, #tpu.memory_space<vmem>>, vector<1x128xf32>
    %81 = vector.broadcast %80 : vector<1x128xf32> to vector<16x128xf32>
    %82 = arith.addf %79, %81 : vector<16x128xf32>
    %cst_78 = arith.constant 0.000000e+00 : f32
    %83 = vector.broadcast %cst_78 : f32 to vector<16x128xf32>
    %84 = arith.maximumf %82, %83 : vector<16x128xf32>
    %c0_79 = arith.constant 0 : index
    %c3_80 = arith.constant 3 : index
    %c0_81 = arith.constant 0 : index
    %c0_82 = arith.constant 0 : index
    %85 = vector.load %arg5[%c0_79, %c3_80, %c0_81, %c0_82] : memref<1x4x16x128xf32, #tpu.memory_space<vmem>>, vector<1x1x16x128xf32>
    %86 = vector.shape_cast %85 : vector<1x1x16x128xf32> to vector<16x128xf32>
    %87 = vector.shape_cast %84 : vector<16x128xf32> to vector<1x1x16x128xf32>
    tpu.vector_store %arg5[%c0_79, %c3_80, %c0_81, %c0_82], %87 {strides = array<i32>} : memref<1x4x16x128xf32, #tpu.memory_space<vmem>>, vector<1x1x16x128xf32>,
    return
  }
  func.func @transform_0(%arg0: i32) -> (i32, i32, i32) {
    %c0_i32 = arith.constant 0 : i32
    %c0_i32_0 = arith.constant 0 : i32
    %c0_i32_1 = arith.constant 0 : i32
    return %arg0, %c0_i32, %c0_i32_0 : i32, i32, i32
  }
  func.func @transform_1(%arg0: i32) -> (i32, i32, i32) {
    %c0_i32 = arith.constant 0 : i32
    %c0_i32_0 = arith.constant 0 : i32
    %c0_i32_1 = arith.constant 0 : i32
    %c0_i32_2 = arith.constant 0 : i32
    return %c0_i32, %c0_i32_0, %c0_i32_1 : i32, i32, i32
  }
  func.func @transform_2(%arg0: i32) -> (i32, i32) {
    %c0_i32 = arith.constant 0 : i32
    %c0_i32_0 = arith.constant 0 : i32
    %c0_i32_1 = arith.constant 0 : i32
    return %c0_i32, %c0_i32_0 : i32, i32
  }
  func.func @transform_3(%arg0: i32) -> (i32, i32) {
    %c0_i32 = arith.constant 0 : i32
    %c0_i32_0 = arith.constant 0 : i32
    %c0_i32_1 = arith.constant 0 : i32
    return %c0_i32, %c0_i32_0 : i32, i32
  }
  func.func @transform_4(%arg0: i32) -> (i32, i32, i32, i32) {
    %c0_i32 = arith.constant 0 : i32
    %c0_i32_0 = arith.constant 0 : i32
    %c0_i32_1 = arith.constant 0 : i32
    %c0_i32_2 = arith.constant 0 : i32
    return %arg0, %c0_i32, %c0_i32_0, %c0_i32_1 : i32, i32, i32, i32
  }
}

</mosaic_0001>

<bundles_post_ra>
// kernel: tile.19
= control target key start
LH: loop header
LB: loop body
LE: loop exit
PB: predicated region body
PF: predicated region fallthrough
CT: control target
= control target key end

     0   :  { %s131_s10 = smov 120   ;;  %s132_s11 = smov 104   ;;  %vm3_vm0 = vcmask 64512   ;;  %vm9_vm1 = vcmask 1048512   ;;  %vm15_vm2 = vcmask 982912   ;;  %vm21_vm3 = vcmask 917312   ;;  %s207_s0 = inlined_call_operand.vmem [shape: f32[16,8], index: 0, kind: input, shape index: {}]   ;;  %s208_s1 = inlined_call_operand.vmem [shape: f32[1,128], index: 1, kind: output, shape index: {}]  }
   0x1   :  { %v101_v0 = vld [vmem:[%s207_s0 + $0xf] sm:$0x1]   ;;  %v103_v1 = vld [vmem:[%s207_s0 + $0xd] sm:$0x1]   ;;  %v102_v2 = vld [vmem:[%s207_s0 + $0xe] sm:$0x1]  }
   0x2   :  { %7 = vrot.lane.b32.xlu0 %v101_v0, %s131_s10  ;;  %19 = vrot.lane.b32.xlu1 %v103_v1, %s132_s11  ;;  %v104_v3 = vld [vmem:[%s207_s0 + $0xc] sm:$0x1]   ;;  %s133_s16 = smov 112   ;;  %s134_s17 = smov 96   ;;  %v105_v4 = vld [vmem:[%s207_s0 + $0xb] sm:$0x1]  }
   0x3   :  { %v106_v5 = vld [vmem:[%s207_s0 + $0xa] sm:$0x1]   ;;  %v2_v6 = vld [vmem:[%s207_s0] sm:$0x1]   ;;  %s135_s24 = smov 88   ;;  %s136_s25 = smov 80  }
   0x4   :  { %4 = vst.msk [vmem:[#allocation0] sm:$0x1] %vm3_vm0, %v2_v6   ;;  %v107_v7 = vld [vmem:[%s207_s0 + $0x9] sm:$0x1]   ;;  %v108_v8 = vld [vmem:[%s207_s0 + $0x8] sm:$0x1]  }
   0x5   :  { %s137_s30 = smov 72   ;;  %s138_s2 = smov 64   ;;  %v109_v9 = vld [vmem:[%s207_s0 + $0x7] sm:$0x1]   ;;  %v110_v10 = vld [vmem:[%s207_s0 + $0x6] sm:$0x1]  }
   0x6   :  { %13 = vrot.lane.b32.xlu0 %v102_v2, %s133_s16  ;;  %25 = vrot.lane.b32.xlu1 %v104_v3, %s134_s17  ;;  %s139_s7 = smov 56   ;;  %s140_s8 = smov 48   ;;  %v111_v11 = vld [vmem:[%s207_s0 + $0x5] sm:$0x1]   ;;  %v112_v12 = vld [vmem:[%s207_s0 + $0x4] sm:$0x1]  }
   0x7   :  { %s141_s13 = smov 40   ;;  %s142_s14 = smov 32   ;;  %v113_v13 = vld [vmem:[%s207_s0 + $0x3] sm:$0x1]   ;;  %v114_v14 = vld [vmem:[%s207_s0 + $0x2] sm:$0x1]  }
   0x8   :  { %s143_s19 = smov 24   ;;  %s144_s20 = smov 16   ;;  %v115_v15 = vld [vmem:[%s207_s0 + $0x1] sm:$0x1]   ;;  %vm27_vm4 = vcmask 851712   ;;  %vm33_vm5 = vcmask 786112  }
   0x9   :  { %s145_s0 = smov 8   ;;  %vm39_vm6 = vcmask 720512   ;;  %vm45_vm7 = vcmask 654912   ;;  %vm51_vm8 = vcmask 589312   ;;  %vm57_vm9 = vcmask 523712  }
   0xa   :  { %31 = vrot.lane.b32.xlu0 %v105_v4, %s135_s24  ;;  %37 = vrot.lane.b32.xlu1 %v106_v5, %s136_s25  ;;  %vm63_vm10 = vcmask 458112   ;;  %vm69_vm11 = vcmask 392512   ;;  %vm75_vm12 = vcmask 326912   ;;  %vm81_vm13 = vcmask 261312  }
   0xb   :  { %vm87_vm14 = vcmask 195712   ;;  %vm93_vm15 = vcmask 130112  }
   0xe   :  { %43 = vrot.lane.b32.xlu0 %v107_v7, %s137_s30  ;;  %49 = vrot.lane.b32.xlu1 %v108_v8, %s138_s2 }
  0x12   :  { %55 = vrot.lane.b32.xlu0 %v109_v9, %s139_s7  ;;  %61 = vrot.lane.b32.xlu1 %v110_v10, %s140_s8 }
  0x16   :  { %67 = vrot.lane.b32.xlu0 %v111_v11, %s141_s13  ;;  %73 = vrot.lane.b32.xlu1 %v112_v12, %s142_s14 }
  0x1a   :  { %79 = vrot.lane.b32.xlu0 %v113_v13, %s143_s19  ;;  %85 = vrot.lane.b32.xlu1 %v114_v14, %s144_s20 }
  0x1e   :  { %91 = vrot.lane.b32.xlu0 %v115_v15, %s145_s0 }
  0x74   :  { %v8_v16 = vpop.permute.xlu0 %7   ;;  %v20_v17 = vpop.permute.xlu1 %19  }
  0x75   :  { %10 = vst.msk [vmem:[#allocation0] sm:$0x1] %vm9_vm1, %v8_v16  }
  0x78   :  { %v14_v18 = vpop.permute.xlu0 %13   ;;  %v26_v19 = vpop.permute.xlu1 %25  }
  0x79   :  { %16 = vst.msk [vmem:[#allocation0] sm:$0x1] %vm15_vm2, %v14_v18  }
  0x7a   :  { %22 = vst.msk [vmem:[#allocation0] sm:$0x1] %vm21_vm3, %v20_v17  }
  0x7b   :  { %28 = vst.msk [vmem:[#allocation0] sm:$0x1] %vm27_vm4, %v26_v19  }
  0x7c   :  { %v32_v20 = vpop.permute.xlu0 %31   ;;  %v38_v21 = vpop.permute.xlu1 %37  }
  0x7d   :  { %34 = vst.msk [vmem:[#allocation0] sm:$0x1] %vm33_vm5, %v32_v20  }
  0x7e   :  { %40 = vst.msk [vmem:[#allocation0] sm:$0x1] %vm39_vm6, %v38_v21  }
  0x80   :  { %v44_v22 = vpop.permute.xlu0 %43   ;;  %v50_v23 = vpop.permute.xlu1 %49  }
  0x81   :  { %46 = vst.msk [vmem:[#allocation0] sm:$0x1] %vm45_vm7, %v44_v22  }
  0x82   :  { %52 = vst.msk [vmem:[#allocation0] sm:$0x1] %vm51_vm8, %v50_v23  }
  0x84   :  { %v56_v24 = vpop.permute.xlu0 %55   ;;  %v62_v25 = vpop.permute.xlu1 %61  }
  0x85   :  { %58 = vst.msk [vmem:[#allocation0] sm:$0x1] %vm57_vm9, %v56_v24  }
  0x86   :  { %64 = vst.msk [vmem:[#allocation0] sm:$0x1] %vm63_vm10, %v62_v25  }
  0x88   :  { %v68_v26 = vpop.permute.xlu0 %67   ;;  %v74_v27 = vpop.permute.xlu1 %73  }
  0x89   :  { %70 = vst.msk [vmem:[#allocation0] sm:$0x1] %vm69_vm11, %v68_v26  }
  0x8a   :  { %76 = vst.msk [vmem:[#allocation0] sm:$0x1] %vm75_vm12, %v74_v27  }
  0x8c   :  { %v80_v28 = vpop.permute.xlu0 %79   ;;  %v86_v29 = vpop.permute.xlu1 %85  }
  0x8d   :  { %82 = vst.msk [vmem:[#allocation0] sm:$0x1] %vm81_vm13, %v80_v28  }
  0x8e   :  { %88 = vst.msk [vmem:[#allocation0] sm:$0x1] %vm87_vm14, %v86_v29  }
  0x90   :  { %v92_v30 = vpop.permute.xlu0 %91  }
  0x91   :  { %94 = vst.msk [vmem:[#allocation0] sm:$0x1] %vm93_vm15, %v92_v30  }
  0x98   :  { %v98_v31 = vld [vmem:[#allocation0] sm:$0x1] }
  0x99   :  { %100 = vst [vmem:[%s208_s1] sm:$0x1] %v98_v31 }

// kernel: tile.18
= control target key start
LH: loop header
LB: loop body
LE: loop exit
PB: predicated region body
PF: predicated region fallthrough
CT: control target
= control target key end

     0   :  { %s28_s0 = inlined_call_operand.vmem [shape: f32[8], index: 0, kind: input, shape index: {}]   ;;  %s29_s1 = inlined_call_operand.vmem [shape: f32[16,8], index: 1, kind: output, shape index: {}]  }
   0x1   :  { %v4_v0 = vld [vmem:[%s28_s0] ss:$0 sm:$0xff] }
   0x2   :  { %5 = vst [vmem:[%s29_s1] sm:$0xff] %v4_v0  ;;  %8 = vst [vmem:[%s29_s1 + $0x8] sm:$0xff] %v4_v0 }

// kernel: conv_transpose2d_module.2
= control target key start
LH: loop header
LB: loop body
LE: loop exit
PB: predicated region body
PF: predicated region fallthrough
CT: control target
= control target key end

     0   :  { %s1538_s9 = smov 0   ;;  %s1821_s0 = inlined_call_operand.vmem [shape: f32[2,18,72], index: 0, kind: input, shape index: {}]   ;;  %s1822_s1 = inlined_call_operand.vmem [shape: f32[8,72,128], index: 1, kind: input, shape index: {}]   ;;  %s1823_s2 = inlined_call_operand.vmem [shape: f32[2,4,2,128], index: 2, kind: output, shape index: {}]  }
   0x1 LB: > { %s1018_s10 = sadd.s32 4294967295, %s1521_s9   ;;  %p1022_p0 = scmp.ge.s32.totalorder %s1521_s9, 1  ;;  %s1521_s9 = sphi %s1538_s9, %s12_s9  }
   0x2   : > { %p112_p1 = scmp.lt.s32.totalorder %s1521_s9, 3 }
   0x4   : > { %p113_p2 = pnand %p1022_p0, %p112_p1 }
   0x5   : > { %v1026_v0 = vld [vmem:[%s1822_s1 + $0x48] sm:$0xff] (!%p113_p2)  ;;  %v1027_v1 = vld [vmem:[%s1822_s1 + $0x50] sm:$0xff] (!%p113_p2)  ;;  %v1048_v2 = vld [vmem:[%s1822_s1 + $0xd8] sm:$0xff] (!%p113_p2)  ;;  %p134_p3 = scmp.lt.s32.totalorder (!%p113_p2), %s1018_s10, 1  ;;  %vm167_vm0 = vcmask (!%p113_p2), 588800  }
   0x6   : > { %116 = sbr.rel (%p113_p2) target bundleno = 312 (0x138), region = 28  ;;  %v1370_v3 = vpack.c.bf16 (!%p113_p2), %v1027_v1, %v1026_v0  ;;  %v1049_v4 = vld [vmem:[%s1822_s1 + $0xe0] sm:$0xff] (!%p113_p2)  ;;  %v1028_v5 = vld [vmem:[%s1822_s1 + $0x58] sm:$0xff] (!%p113_p2)  ;;  %v1050_v9 = vld [vmem:[%s1822_s1 + $0xe8] sm:$0xff] (!%p113_p2) }
   0x7   : > { %v1029_v6 = vld [vmem:[%s1822_s1 + $0x60] sm:$0xff] (!%p113_p2)  ;;  %v1402_v7 = vpack.c.bf16 (!%p113_p2), %v1049_v4, %v1048_v2  ;;  %v1051_v10 = vld [vmem:[%s1822_s1 + $0xf0] sm:$0xff] (!%p113_p2)  ;;  %v1030_v11 = vld [vmem:[%s1822_s1 + $0x68] sm:$0xff] (!%p113_p2) }
   0x8   : > { %v1374_v8 = vpack.c.bf16 (!%p113_p2), %v1029_v6, %v1028_v5  ;;  %1371 = vmatprep.subr.bf16.mxu0 (!%p113_p2), %v1370_v3  ;;  %v1406_v12 = vpack.c.bf16 (!%p113_p2), %v1051_v10, %v1050_v9  ;;  %v1031_v13 = vld [vmem:[%s1822_s1 + $0x70] sm:$0xff] (!%p113_p2)  ;;  %v1052_v14 = vld [vmem:[%s1822_s1 + $0xf8] sm:$0xff] (!%p113_p2)  ;;  %v1053_v15 = vld [vmem:[%s1822_s1 + $0x100] sm:$0xff] (!%p113_p2) }
   0x9   : > { %1403 = vmatprep.subr.bf16.mxu1 (!%p113_p2), %v1402_v7  ;;  %1373 = vmatpush3.bf16.msra.mxu0 (!%p113_p2), %v1370_v3  ;;  %v1378_v16 = vpack.c.bf16 (!%p113_p2), %v1031_v13, %v1030_v11  ;;  %v1410_v17 = vpack.c.bf16 (!%p113_p2), %v1053_v15, %v1052_v14  ;;  %v1032_v18 = vld [vmem:[%s1822_s1 + $0x78] sm:$0xff] (!%p113_p2)  ;;  %v1033_v19 = vld [vmem:[%s1822_s1 + $0x80] sm:$0xff] (!%p113_p2)  ;;  %v1054_v20 = vld [vmem:[%s1822_s1 + $0x108] sm:$0xff] (!%p113_p2) }
   0xa   : > { %1405 = vmatpush3.bf16.msra.mxu1 (!%p113_p2), %v1402_v7  ;;  %1375 = vmatprep.subr.bf16.mxu0 (!%p113_p2), %v1374_v8  ;;  %v1055_v21 = vld [vmem:[%s1822_s1 + $0x110] sm:$0xff] (!%p113_p2)  ;;  %v1382_v23 = vpack.c.bf16 (!%p113_p2), %v1033_v19, %v1032_v18  ;;  %v1034_v25 = vld [vmem:[%s1822_s1 + $0x88] sm:$0xff] (!%p113_p2)  ;;  %v146_v26 = vld [vmem:[%s1822_s1] sm:$0xff] (!%p113_p2) }
   0xb   : > { %1407 = vmatprep.subr.bf16.mxu1 (!%p113_p2), %v1406_v12  ;;  %v1414_v24 = vpack.c.bf16 (!%p113_p2), %v1055_v21, %v1054_v20  ;;  %v147_v27 = vld [vmem:[%s1822_s1 + $0x8] sm:$0xff] (!%p113_p2)  ;;  %v1056_v28 = vld [vmem:[%s1822_s1 + $0x118] sm:$0xff] (!%p113_p2)  ;;  %v1039_v29 = vld [vmem:[%s1822_s1 + $0x90] sm:$0xff] (!%p113_p2) }
   0xc   : > { %v1040_v30 = vld [vmem:[%s1822_s1 + $0x98] sm:$0xff] (!%p113_p2)  ;;  %v1386_v31 = vpack.c.bf16 (!%p113_p2), %v147_v27, %v146_v26  ;;  %v148_v32 = vld [vmem:[%s1822_s1 + $0x10] sm:$0xff] (!%p113_p2)  ;;  %v1041_v35 = vld [vmem:[%s1822_s1 + $0xa0] sm:$0xff] (!%p113_p2) }
   0xd   : > { %s1825_s10 = smov (!%p134_p3, %s1018_s10), 1  ;;  %1377 = vmatpush3.bf16.msra.mxu0 %v1374_v8  ;;  %v149_v33 = vld [vmem:[%s1822_s1 + $0x18] sm:$0xff]  ;;  %v1418_v34 = vpack.c.bf16 %v1040_v30, %v1039_v29  ;;  %v1042_v36 = vld [vmem:[%s1822_s1 + $0xa8] sm:$0xff]  ;;  %v150_v40 = vld [vmem:[%s1822_s1 + $0x20] sm:$0xff] }
   0xe   : > { %s1506_s7 = smul.u32 24, %s1825_s10  ;;  %1409 = vmatpush3.bf16.msra.mxu1 %v1406_v12  ;;  %1379 = vmatprep.subr.bf16.mxu0 %v1378_v16  ;;  %v1390_v38 = vpack.c.bf16 %v149_v33, %v148_v32  ;;  %v1422_v39 = vpack.c.bf16 %v1042_v36, %v1041_v35  ;;  %v151_v41 = vld [vmem:[%s1822_s1 + $0x28] sm:$0xff]  ;;  %v1043_v42 = vld [vmem:[%s1822_s1 + $0xb0] sm:$0xff]  ;;  %v1044_v43 = vld [vmem:[%s1822_s1 + $0xb8] sm:$0xff]  ;;  %s1113_s4 = sshll.u32 %s1825_s10, 3 }
   0xf   : > { %1411 = vmatprep.subr.bf16.mxu1 %v1410_v17  ;;  %v1394_v45 = vpack.c.bf16 %v151_v41, %v150_v40  ;;  %v1426_v46 = vpack.c.bf16 %v1044_v43, %v1043_v42  ;;  %v152_v47 = vld [vmem:[%s1822_s1 + $0x30] sm:$0xff]  ;;  %v153_v48 = vld [vmem:[%s1822_s1 + $0x38] sm:$0xff]  ;;  %v1045_v49 = vld [vmem:[%s1822_s1 + $0xc0] sm:$0xff] }
  0x10   : > { %s1594_s16 = scalar_lea.vmem %s1821_s0, %s1506_s7  ;;  %v1046_v50 = vld [vmem:[%s1822_s1 + $0xc8] sm:$0xff]  ;;  %v1398_v51 = vpack.c.bf16 %v153_v48, %v152_v47  ;;  %v154_v53 = vld [vmem:[%s1822_s1 + $0x40] sm:$0xff]  ;;  %v1047_v54 = vld [vmem:[%s1822_s1 + $0xd0] sm:$0xff]  ;;  %s1808_s7 = scalar_lea.vmem %s1823_s2, %s1113_s4 }
  0x11   : > { %v1603_v22 = vld [vmem:[%s1594_s16 + $0x1] sm:$0xff]  ;;  %1381 = vmatpush3.bf16.msra.mxu0 %v1378_v16  ;;  %v1640_v37 = vld [vmem:[%s1594_s16 + $0x9] sm:$0xff]  ;;  %v1430_v52 = vpack.c.bf16 %v1046_v50, %v1045_v49  ;;  %v1096_v57 = vld [vmem:[%s1822_s1 + $0x1f8] sm:$0xff] }
  0x12   : > { %1220 = vmatprep.mubr.msk.f32.mxu0 %vm167_vm0, %v1603_v22  ;;  %1262 = vmatprep.mubr.msk.f32.mxu1 %vm167_vm0, %v1603_v22  ;;  %v144_v44 = vld [vmem:[%s1594_s16] sm:$0xff]  ;;  %v1072_v55 = vld [vmem:[%s1822_s1 + $0x168] sm:$0xff]  ;;  %v1073_v56 = vld [vmem:[%s1822_s1 + $0x170] sm:$0xff] }
  0x13   : > { %1413 = vmatpush3.bf16.msra.mxu1 %v1410_v17  ;;  %1383 = vmatprep.subr.bf16.mxu0 %v1382_v23  ;;  %v1097_v58 = vld [vmem:[%s1822_s1 + $0x200] sm:$0xff]  ;;  %v1074_v59 = vld [vmem:[%s1822_s1 + $0x178] sm:$0xff]  ;;  %v145_v61 = vld [vmem:[%s1594_s16 + $0x8] sm:$0xff]  ;;  %v1434_v62 = vpack.c.bf16 %v1073_v56, %v1072_v55 }
  0x14   : > { %1415 = vmatprep.subr.bf16.mxu1 %v1414_v24  ;;  %v1075_v60 = vld [vmem:[%s1822_s1 + $0x180] sm:$0xff]  ;;  %v1098_v63 = vld [vmem:[%s1822_s1 + $0x208] sm:$0xff]  ;;  %v1099_v0 = vld [vmem:[%s1822_s1 + $0x210] sm:$0xff]  ;;  %v1466_v1 = vpack.c.bf16 %v1097_v58, %v1096_v57 }
  0x15   : > { %1385 = vmatpush3.bf16.msra.mxu0 %v1382_v23  ;;  %v1438_v2 = vpack.c.bf16 %v1075_v60, %v1074_v59  ;;  %v1470_v3 = vpack.c.bf16 %v1099_v0, %v1098_v63  ;;  %v1076_v4 = vld [vmem:[%s1822_s1 + $0x188] sm:$0xff]  ;;  %v1077_v5 = vld [vmem:[%s1822_s1 + $0x190] sm:$0xff]  ;;  %v1100_v6 = vld [vmem:[%s1822_s1 + $0x218] sm:$0xff] }
  0x16   : > { %1218 = vmatprep.subr.mxu0 %v1034_v25  ;;  %v1101_v7 = vld [vmem:[%s1822_s1 + $0x220] sm:$0xff]  ;;  %v1442_v9 = vpack.c.bf16 %v1077_v5, %v1076_v4  ;;  %v1078_v11 = vld [vmem:[%s1822_s1 + $0x198] sm:$0xff]  ;;  %v1102_v13 = vld [vmem:[%s1822_s1 + $0x228] sm:$0xff] }
  0x17   : > { %1417 = vmatpush3.bf16.msra.mxu1 %v1414_v24  ;;  %v565_v8 = vld [vmem:[%s1594_s16 + $0x2] sm:$0xff]  ;;  %v1474_v10 = vpack.c.bf16 %v1101_v7, %v1100_v6  ;;  %v1103_v14 = vld [vmem:[%s1822_s1 + $0x230] sm:$0xff]  ;;  %v1104_v20 = vld [vmem:[%s1822_s1 + $0x238] sm:$0xff] }
  0x18   : > { %1260 = vmatprep.subr.mxu1 %v1056_v28  ;;  %v1079_v12 = vld [vmem:[%s1822_s1 + $0x1a0] sm:$0xff]  ;;  %v1478_v16 = vpack.c.bf16 %v1103_v14, %v1102_v13  ;;  %v1080_v17 = vld [vmem:[%s1822_s1 + $0x1a8] sm:$0xff]  ;;  %v1087_v21 = vld [vmem:[%s1822_s1 + $0x1b0] sm:$0xff] }
  0x19   : > { %1219 = vmatpush3.msra.mxu0 %v1034_v25  ;;  %v1446_v15 = vpack.c.bf16 %v1079_v12, %v1078_v11  ;;  %v1063_v18 = vld [vmem:[%s1822_s1 + $0x120] sm:$0xff]  ;;  %v1064_v19 = vld [vmem:[%s1822_s1 + $0x128] sm:$0xff]  ;;  %v1088_v23 = vld [vmem:[%s1822_s1 + $0x1b8] sm:$0xff] }
  0x1a   : > { %1387 = vmatprep.subr.bf16.mxu0 %v1386_v31  ;;  %1221 = vmatmul.mubr.msk.f32.vlgmr.msra.gmra.mrb[0].mxu0 %vm167_vm0, %v1640_v37  ;;  %v1450_v24 = vpack.c.bf16 %v1064_v19, %v1063_v18  ;;  %v1065_v25 = vld [vmem:[%s1822_s1 + $0x130] sm:$0xff]  ;;  %v1066_v26 = vld [vmem:[%s1822_s1 + $0x138] sm:$0xff]  ;;  %v1482_v27 = vpack.c.bf16 %v1088_v23, %v1087_v21  ;;  %v1090_v29 = vld [vmem:[%s1822_s1 + $0x1c8] sm:$0xff] }
  0x1b   : > { %1261 = vmatpush3.msra.mxu1 %v1056_v28  ;;  %1389 = vmatpush3.bf16.msra.mxu0 %v1386_v31  ;;  %v1089_v28 = vld [vmem:[%s1822_s1 + $0x1c0] sm:$0xff]  ;;  %v566_v30 = vld [vmem:[%s1594_s16 + $0xa] sm:$0xff]  ;;  %v1454_v31 = vpack.c.bf16 %v1066_v26, %v1065_v25  ;;  %v1092_v36 = vld [vmem:[%s1822_s1 + $0x1d8] sm:$0xff] }
  0x1c   : > { %1419 = vmatprep.subr.bf16.mxu1 %v1418_v34  ;;  %1263 = vmatmul.mubr.msk.f32.vlgmr.msra.gmra.mrb[0].mxu1 %vm167_vm0, %v1640_v37  ;;  %v1486_v32 = vpack.c.bf16 %v1090_v29, %v1089_v28  ;;  %v1067_v33 = vld [vmem:[%s1822_s1 + $0x140] sm:$0xff]  ;;  %v1091_v35 = vld [vmem:[%s1822_s1 + $0x1d0] sm:$0xff]  ;;  %v1070_v41 = vld [vmem:[%s1822_s1 + $0x158] sm:$0xff] }
  0x1d   : > { %1421 = vmatpush3.bf16.msra.mxu1 %v1418_v34  ;;  %1391 = vmatprep.subr.bf16.mxu0 %v1390_v38  ;;  %v1068_v34 = vld [vmem:[%s1822_s1 + $0x148] sm:$0xff]  ;;  %v1069_v40 = vld [vmem:[%s1822_s1 + $0x150] sm:$0xff]  ;;  %v1093_v42 = vld [vmem:[%s1822_s1 + $0x1e0] sm:$0xff] }
  0x1e   : > { %1423 = vmatprep.subr.bf16.mxu1 %v1422_v39  ;;  %1241 = vmatprep.mubr.msk.f32.mxu0 %vm167_vm0, %v144_v44  ;;  %v1094_v43 = vld [vmem:[%s1822_s1 + $0x1e8] sm:$0xff]  ;;  %v1095_v47 = vld [vmem:[%s1822_s1 + $0x1f0] sm:$0xff] }
  0x1f   : > { %1283 = vmatprep.mubr.msk.f32.mxu1 %vm167_vm0, %v144_v44  ;;  %1393 = vmatpush3.bf16.msra.mxu0 %v1390_v38  ;;  %v1458_v38 = vpack.c.bf16 %v1068_v34, %v1067_v33  ;;  %v1462_v44 = vpack.c.bf16 %v1070_v41, %v1069_v40 }
  0x20   : > { %1395 = vmatprep.subr.bf16.mxu0 %v1394_v45 }
  0x21   : > { %1425 = vmatpush3.bf16.msra.mxu1 %v1422_v39  ;;  %v1490_v39 = vpack.c.bf16 %v1092_v36, %v1091_v35 }
  0x22   : > { %1427 = vmatprep.subr.bf16.mxu1 %v1426_v46 }
  0x23   : > { %1397 = vmatpush3.bf16.msra.mxu0 %v1394_v45  ;;  %v1494_v45 = vpack.c.bf16 %v1094_v43, %v1093_v42 }
  0x24   : > { %1399 = vmatprep.subr.bf16.mxu0 %v1398_v51 }
  0x25   : > { %1429 = vmatpush3.bf16.msra.mxu1 %v1426_v46  ;;  %v1071_v46 = vld [vmem:[%s1822_s1 + $0x160] sm:$0xff] }
  0x26   : > { %1431 = vmatprep.subr.bf16.mxu1 %v1430_v52 }
  0x27   : > { %1401 = vmatpush3.bf16.msra.mxu0 %v1398_v51 }
  0x28   : > { %1239 = vmatprep.subr.mxu0 %v154_v53 }
  0x29   : > { %1433 = vmatpush3.bf16.msra.mxu1 %v1430_v52 }
  0x2a   : > { %1281 = vmatprep.subr.mxu1 %v1047_v54 }
  0x2b   : > { %1240 = vmatpush3.msra.mxu0 %v154_v53 }
  0x2c   : > { %1242 = vmatmul.mubr.msk.f32.vlgmr.msra.gmra.mrb[0].mxu0 %vm167_vm0, %v145_v61  ;;  %1435 = vmatprep.subr.bf16.mxu0 %v1434_v62 }
  0x2d   : > { %1282 = vmatpush3.msra.mxu1 %v1047_v54  ;;  %1437 = vmatpush3.bf16.msra.mxu0 %v1434_v62 }
  0x2e   : > { %1284 = vmatmul.mubr.msk.f32.vlgmr.msra.gmra.mrb[0].mxu1 %vm167_vm0, %v145_v61  ;;  %1467 = vmatprep.subr.bf16.mxu1 %v1466_v1 }
  0x2f   : > { %1469 = vmatpush3.bf16.msra.mxu1 %v1466_v1  ;;  %1439 = vmatprep.subr.bf16.mxu0 %v1438_v2 }
  0x30   : > { %1471 = vmatprep.subr.bf16.mxu1 %v1470_v3  ;;  %1304 = vmatprep.mubr.msk.f32.mxu0 %vm167_vm0, %v565_v8 }
  0x31   : > { %1346 = vmatprep.mubr.msk.f32.mxu1 %vm167_vm0, %v565_v8  ;;  %1441 = vmatpush3.bf16.msra.mxu0 %v1438_v2 }
  0x32   : > { %1443 = vmatprep.subr.bf16.mxu0 %v1442_v9 }
  0x33   : > { %1473 = vmatpush3.bf16.msra.mxu1 %v1470_v3 }
  0x34   : > { %1475 = vmatprep.subr.bf16.mxu1 %v1474_v10 }
  0x35   : > { %1445 = vmatpush3.bf16.msra.mxu0 %v1442_v9 }
  0x36   : > { %1447 = vmatprep.subr.bf16.mxu0 %v1446_v15 }
  0x37   : > { %1477 = vmatpush3.bf16.msra.mxu1 %v1474_v10 }
  0x38   : > { %1479 = vmatprep.subr.bf16.mxu1 %v1478_v16 }
  0x39   : > { %1449 = vmatpush3.bf16.msra.mxu0 %v1446_v15 }
  0x3a   : > { %1302 = vmatprep.subr.mxu0 %v1080_v17 }
  0x3b   : > { %1481 = vmatpush3.bf16.msra.mxu1 %v1478_v16 }
  0x3c   : > { %1344 = vmatprep.subr.mxu1 %v1104_v20 }
  0x3d   : > { %1303 = vmatpush3.msra.mxu0 %v1080_v17 }
  0x3e   : > { %1451 = vmatprep.subr.bf16.mxu0 %v1450_v24  ;;  %1305 = vmatmul.mubr.msk.f32.vlgmr.msra.gmra.mrb[2].mxu0 %vm167_vm0, %v566_v30 }
  0x3f   : > { %1345 = vmatpush3.msra.mxu1 %v1104_v20  ;;  %1453 = vmatpush3.bf16.msra.mxu0 %v1450_v24 }
  0x40   : > { %1483 = vmatprep.subr.bf16.mxu1 %v1482_v27  ;;  %1347 = vmatmul.mubr.msk.f32.vlgmr.msra.gmra.mrb[2].mxu1 %vm167_vm0, %v566_v30 }
  0x41   : > { %1485 = vmatpush3.bf16.msra.mxu1 %v1482_v27  ;;  %1455 = vmatprep.subr.bf16.mxu0 %v1454_v31 }
  0x42   : > { %1487 = vmatprep.subr.bf16.mxu1 %v1486_v32  ;;  %1325 = vmatprep.mubr.msk.f32.mxu0 %vm167_vm0, %v1603_v22 }
  0x43   : > { %1367 = vmatprep.mubr.msk.f32.mxu1 %vm167_vm0, %v1603_v22  ;;  %1457 = vmatpush3.bf16.msra.mxu0 %v1454_v31 }
  0x44   : > { %1459 = vmatprep.subr.bf16.mxu0 %v1458_v38 }
  0x45   : > { %1489 = vmatpush3.bf16.msra.mxu1 %v1486_v32 }
  0x46   : > { %1491 = vmatprep.subr.bf16.mxu1 %v1490_v39 }
  0x47   : > { %1461 = vmatpush3.bf16.msra.mxu0 %v1458_v38 }
  0x48   : > { %1463 = vmatprep.subr.bf16.mxu0 %v1462_v44 }
  0x49   : > { %1493 = vmatpush3.bf16.msra.mxu1 %v1490_v39 }
  0x4a   : > { %1495 = vmatprep.subr.bf16.mxu1 %v1494_v45 }
  0x4b   : > { %1465 = vmatpush3.bf16.msra.mxu0 %v1462_v44 }
  0x4c   : > { %1323 = vmatprep.subr.mxu0 %v1071_v46 }
  0x4d   : > { %1497 = vmatpush3.bf16.msra.mxu1 %v1494_v45 }
  0x4e   : > { %1365 = vmatprep.subr.mxu1 %v1095_v47 }
  0x4f   : > { %1324 = vmatpush3.msra.mxu0 %v1071_v46 }
  0x50   : > { %1326 = vmatmul.mubr.msk.f32.vlgmr.msra.gmra.mrb[2].mxu0 %vm167_vm0, %v1640_v37 }
  0x51   : > { %1366 = vmatpush3.msra.mxu1 %v1095_v47 }
  0x52   : > { %1368 = vmatmul.mubr.msk.f32.vlgmr.msra.gmra.mrb[2].mxu1 %vm167_vm0, %v1640_v37 }
  0xff   : > { %v1243_v22 = vpop.f32.mrb[0].mxu0 }
 0x100   : > { %v339_v48 = vmul.f32 %v1243_v22, %v1243_v22  ;;  %v321_v50 = vpop.f32.mrb[1].mxu0 }
 0x101   : > { %v1285_v49 = vpop.f32.mrb[0].mxu1  ;;  %v330_v52 = vadd.f32 %v1243_v22, %v321_v50  ;;  %v338_v53 = vmul.f32 %v321_v50, %v321_v50 }
 0x102   : > { %v544_v51 = vmul.f32 %v1285_v49, %v1285_v49  ;;  %v525_v54 = vpop.f32.mrb[1].mxu1 }
 0x103   : > { %v534_v55 = vadd.f32 %v1285_v49, %v525_v54  ;;  %v543_v56 = vmul.f32 %v525_v54, %v525_v54  ;;  %v331_v57 = vrot.slane %v330_v52, 4  ;;  %v340_v58 = vadd.f32 %v339_v48, %v338_v53 }
 0x105   : > { %v535_v59 = vrot.slane %v534_v55, 4  ;;  %v545_v60 = vadd.f32 %v544_v51, %v543_v56  ;;  %v332_v61 = vadd.f32 %v331_v57, %v330_v52  ;;  %v341_v62 = vrot.slane %v340_v58, 4 }
 0x107   : > { %v536_v63 = vadd.f32 %v535_v59, %v534_v55  ;;  %v546_v0 = vrot.slane %v545_v60, 4  ;;  %v333_v37 = vrot.slane %v332_v61, 2  ;;  %v342_v1 = vadd.f32 %v341_v62, %v340_v58 }
 0x109   : > { %v537_v2 = vrot.slane %v536_v63, 2  ;;  %v547_v3 = vadd.f32 %v546_v0, %v545_v60  ;;  %v334_v4 = vadd.f32 %v333_v37, %v332_v61  ;;  %v343_v5 = vrot.slane %v342_v1, 2 }
 0x10b   : > { %v538_v6 = vadd.f32 %v537_v2, %v536_v63  ;;  %v548_v7 = vrot.slane %v547_v3, 2  ;;  %v335_v8 = vrot.slane %v334_v4, 1  ;;  %v344_v9 = vadd.f32 %v343_v5, %v342_v1 }
 0x10d   : > { %v539_v10 = vrot.slane %v538_v6, 1  ;;  %v549_v11 = vadd.f32 %v548_v7, %v547_v3  ;;  %v336_v12 = vadd.f32 %v335_v8, %v334_v4  ;;  %v345_v13 = vrot.slane %v344_v9, 1 }
 0x10f   : > { %v540_v14 = vadd.f32 %v539_v10, %v538_v6  ;;  %v550_v15 = vrot.slane %v549_v11, 1  ;;  %337 = vst [vmem:[%s1808_s7] sm:$0x1] %v336_v12  ;;  %v346_v16 = vadd.f32 %v345_v13, %v344_v9 }
 0x111   : > { %1061 = vst [vmem:[%s1808_s7 + $0x2] sm:$0x1] %v540_v14  ;;  %v551_v17 = vadd.f32 %v550_v15, %v549_v11  ;;  %347 = vst [vmem:[%s1808_s7 + $0x1] sm:$0x1] %v346_v16 }
 0x113   : > { %1062 = vst [vmem:[%s1808_s7 + $0x3] sm:$0x1] %v551_v17 }
 0x123   : > { %v1327_v18 = vpop.f32.mrb[2].mxu0 }
 0x124   : > { %v749_v19 = vmul.f32 %v1327_v18, %v1327_v18  ;;  %v730_v21 = vpop.f32.mrb[3].mxu0 }
 0x125   : > { %v1369_v20 = vpop.f32.mrb[2].mxu1  ;;  %v739_v24 = vadd.f32 %v1327_v18, %v730_v21  ;;  %v748_v25 = vmul.f32 %v730_v21, %v730_v21 }
 0x126   : > { %v954_v23 = vmul.f32 %v1369_v20, %v1369_v20  ;;  %v935_v26 = vpop.f32.mrb[3].mxu1 }
 0x127   : > { %v944_v27 = vadd.f32 %v1369_v20, %v935_v26  ;;  %v953_v28 = vmul.f32 %v935_v26, %v935_v26  ;;  %v740_v29 = vrot.slane %v739_v24, 4  ;;  %v750_v30 = vadd.f32 %v749_v19, %v748_v25 }
 0x129   : > { %v945_v31 = vrot.slane %v944_v27, 4  ;;  %v955_v32 = vadd.f32 %v954_v23, %v953_v28  ;;  %v741_v33 = vadd.f32 %v740_v29, %v739_v24  ;;  %v751_v34 = vrot.slane %v750_v30, 4 }
 0x12b   : > { %v946_v35 = vadd.f32 %v945_v31, %v944_v27  ;;  %v956_v36 = vrot.slane %v955_v32, 4  ;;  %v742_v38 = vrot.slane %v741_v33, 2  ;;  %v752_v39 = vadd.f32 %v751_v34, %v750_v30 }
 0x12d   : > { %v947_v40 = vrot.slane %v946_v35, 2  ;;  %v957_v41 = vadd.f32 %v956_v36, %v955_v32  ;;  %v743_v42 = vadd.f32 %v742_v38, %v741_v33  ;;  %v753_v43 = vrot.slane %v752_v39, 2 }
 0x12f   : > { %v948_v44 = vadd.f32 %v947_v40, %v946_v35  ;;  %v958_v45 = vrot.slane %v957_v41, 2  ;;  %v744_v46 = vrot.slane %v743_v42, 1  ;;  %v754_v47 = vadd.f32 %v753_v43, %v752_v39 }
 0x131   : > { %v949_v22 = vrot.slane %v948_v44, 1  ;;  %v959_v48 = vadd.f32 %v958_v45, %v957_v41  ;;  %v745_v49 = vadd.f32 %v744_v46, %v743_v42  ;;  %v755_v50 = vrot.slane %v754_v47, 1 }
 0x133   : > { %v950_v51 = vadd.f32 %v949_v22, %v948_v44  ;;  %v960_v52 = vrot.slane %v959_v48, 1  ;;  %1085 = vst [vmem:[%s1808_s7 + $0x4] sm:$0x1] %v745_v49  ;;  %v756_v53 = vadd.f32 %v755_v50, %v754_v47 }
 0x135   : > { %1109 = vst [vmem:[%s1808_s7 + $0x6] sm:$0x1] %v950_v51  ;;  %v961_v54 = vadd.f32 %v960_v52, %v959_v48  ;;  %1086 = vst [vmem:[%s1808_s7 + $0x5] sm:$0x1] %v756_v53 }
 0x137   : > { %1110 = vst [vmem:[%s1808_s7 + $0x7] sm:$0x1] %v961_v54 }
 0x138 PF: > { %s12_s9 = sadd.s32 1, %s1521_s9  }
 0x139   : > { %p9_p4 = scmp.ge.s32.totalorder %s12_s9, 4  }
 0x13b   :  { %11 = sbr.rel (!%p9_p4) target bundleno = 1 (0x1), region = 68 }

// kernel: conv_transpose2d_module.3
= control target key start
LH: loop header
LB: loop body
LE: loop exit
PB: predicated region body
PF: predicated region fallthrough
CT: control target
= control target key end

     0   :  { %s1626_s15 = smov 0   ;;  %s1915_s0 = inlined_call_operand.vmem [shape: f32[2,18,72], index: 0, kind: input, shape index: {}]   ;;  %s1916_s1 = inlined_call_operand.vmem [shape: f32[8,72,128], index: 1, kind: input, shape index: {}]   ;;  %s1917_s2 = inlined_call_operand.vmem [shape: f32[1,128], index: 2, kind: input, shape index: {}]   ;;  %s1918_s3 = inlined_call_operand.vmem [shape: f32[1,128], index: 3, kind: input, shape index: {}]   ;;  %s1919_s4 = inlined_call_operand.vmem [shape: f32[2,4,16,128], index: 4, kind: output, shape index: {}]  }
   0x1 LB: > { %s1088_s16 = sadd.s32 4294967295, %s1599_s15   ;;  %p1092_p0 = scmp.ge.s32.totalorder %s1599_s15, 1  ;;  %s1599_s15 = sphi %s1626_s15, %s14_s15  }
   0x2   : > { %p162_p1 = scmp.lt.s32.totalorder %s1599_s15, 3 }
   0x4   : > { %p163_p2 = pnand %p1092_p0, %p162_p1 }
   0x5   : > { %v1096_v0 = vld [vmem:[%s1916_s1 + $0x48] sm:$0xff] (!%p163_p2)  ;;  %v1097_v1 = vld [vmem:[%s1916_s1 + $0x50] sm:$0xff] (!%p163_p2)  ;;  %v1120_v2 = vld [vmem:[%s1916_s1 + $0xd8] sm:$0xff] (!%p163_p2)  ;;  %p188_p3 = scmp.lt.s32.totalorder (!%p163_p2), %s1088_s16, 1  ;;  %vm221_vm0 = vcmask (!%p163_p2), 588800  }
   0x6   : > { %166 = sbr.rel (%p163_p2) target bundleno = 302 (0x12e), region = 36  ;;  %v1448_v3 = vpack.c.bf16 (!%p163_p2), %v1097_v1, %v1096_v0  ;;  %v1121_v4 = vld [vmem:[%s1916_s1 + $0xe0] sm:$0xff] (!%p163_p2)  ;;  %v1098_v5 = vld [vmem:[%s1916_s1 + $0x58] sm:$0xff] (!%p163_p2)  ;;  %v1122_v9 = vld [vmem:[%s1916_s1 + $0xe8] sm:$0xff] (!%p163_p2) }
   0x7   : > { %v1099_v6 = vld [vmem:[%s1916_s1 + $0x60] sm:$0xff] (!%p163_p2)  ;;  %v1480_v7 = vpack.c.bf16 (!%p163_p2), %v1121_v4, %v1120_v2  ;;  %v1123_v10 = vld [vmem:[%s1916_s1 + $0xf0] sm:$0xff] (!%p163_p2)  ;;  %v1100_v11 = vld [vmem:[%s1916_s1 + $0x68] sm:$0xff] (!%p163_p2) }
   0x8   : > { %v1452_v8 = vpack.c.bf16 (!%p163_p2), %v1099_v6, %v1098_v5  ;;  %1449 = vmatprep.subr.bf16.mxu0 (!%p163_p2), %v1448_v3  ;;  %v1484_v12 = vpack.c.bf16 (!%p163_p2), %v1123_v10, %v1122_v9  ;;  %v1101_v13 = vld [vmem:[%s1916_s1 + $0x70] sm:$0xff] (!%p163_p2)  ;;  %v1124_v14 = vld [vmem:[%s1916_s1 + $0xf8] sm:$0xff] (!%p163_p2)  ;;  %v1125_v15 = vld [vmem:[%s1916_s1 + $0x100] sm:$0xff] (!%p163_p2) }
   0x9   : > { %1481 = vmatprep.subr.bf16.mxu1 (!%p163_p2), %v1480_v7  ;;  %1451 = vmatpush3.bf16.msra.mxu0 (!%p163_p2), %v1448_v3  ;;  %v1456_v16 = vpack.c.bf16 (!%p163_p2), %v1101_v13, %v1100_v11  ;;  %v1488_v17 = vpack.c.bf16 (!%p163_p2), %v1125_v15, %v1124_v14  ;;  %v1102_v18 = vld [vmem:[%s1916_s1 + $0x78] sm:$0xff] (!%p163_p2)  ;;  %v1103_v19 = vld [vmem:[%s1916_s1 + $0x80] sm:$0xff] (!%p163_p2)  ;;  %v1126_v20 = vld [vmem:[%s1916_s1 + $0x108] sm:$0xff] (!%p163_p2) }
   0xa   : > { %1483 = vmatpush3.bf16.msra.mxu1 (!%p163_p2), %v1480_v7  ;;  %1453 = vmatprep.subr.bf16.mxu0 (!%p163_p2), %v1452_v8  ;;  %v1127_v21 = vld [vmem:[%s1916_s1 + $0x110] sm:$0xff] (!%p163_p2)  ;;  %v1460_v23 = vpack.c.bf16 (!%p163_p2), %v1103_v19, %v1102_v18  ;;  %v1104_v25 = vld [vmem:[%s1916_s1 + $0x88] sm:$0xff] (!%p163_p2)  ;;  %v200_v26 = vld [vmem:[%s1916_s1] sm:$0xff] (!%p163_p2) }
   0xb   : > { %1485 = vmatprep.subr.bf16.mxu1 (!%p163_p2), %v1484_v12  ;;  %v1492_v24 = vpack.c.bf16 (!%p163_p2), %v1127_v21, %v1126_v20  ;;  %v201_v27 = vld [vmem:[%s1916_s1 + $0x8] sm:$0xff] (!%p163_p2)  ;;  %v1128_v28 = vld [vmem:[%s1916_s1 + $0x118] sm:$0xff] (!%p163_p2)  ;;  %v1111_v29 = vld [vmem:[%s1916_s1 + $0x90] sm:$0xff] (!%p163_p2) }
   0xc   : > { %v1112_v30 = vld [vmem:[%s1916_s1 + $0x98] sm:$0xff] (!%p163_p2)  ;;  %v1464_v31 = vpack.c.bf16 (!%p163_p2), %v201_v27, %v200_v26  ;;  %v202_v32 = vld [vmem:[%s1916_s1 + $0x10] sm:$0xff] (!%p163_p2)  ;;  %v1113_v35 = vld [vmem:[%s1916_s1 + $0xa0] sm:$0xff] (!%p163_p2) }
   0xd   : > { %s1921_s16 = smov (!%p188_p3, %s1088_s16), 1  ;;  %1455 = vmatpush3.bf16.msra.mxu0 %v1452_v8  ;;  %v203_v33 = vld [vmem:[%s1916_s1 + $0x18] sm:$0xff]  ;;  %v1496_v34 = vpack.c.bf16 %v1112_v30, %v1111_v29  ;;  %v1114_v36 = vld [vmem:[%s1916_s1 + $0xa8] sm:$0xff]  ;;  %v204_v40 = vld [vmem:[%s1916_s1 + $0x20] sm:$0xff] }
   0xe   : > { %s1584_s17 = smul.u32 24, %s1921_s16  ;;  %1487 = vmatpush3.bf16.msra.mxu1 %v1484_v12  ;;  %1457 = vmatprep.subr.bf16.mxu0 %v1456_v16  ;;  %v1468_v38 = vpack.c.bf16 %v203_v33, %v202_v32  ;;  %v1500_v39 = vpack.c.bf16 %v1114_v36, %v1113_v35  ;;  %v205_v41 = vld [vmem:[%s1916_s1 + $0x28] sm:$0xff]  ;;  %v1115_v42 = vld [vmem:[%s1916_s1 + $0xb0] sm:$0xff]  ;;  %v1116_v43 = vld [vmem:[%s1916_s1 + $0xb8] sm:$0xff]  ;;  %s1191_s29 = sshll.u32 %s1921_s16, 6 }
   0xf   : > { %1489 = vmatprep.subr.bf16.mxu1 %v1488_v17  ;;  %v1472_v45 = vpack.c.bf16 %v205_v41, %v204_v40  ;;  %v1504_v46 = vpack.c.bf16 %v1116_v43, %v1115_v42  ;;  %v206_v47 = vld [vmem:[%s1916_s1 + $0x30] sm:$0xff]  ;;  %v207_v48 = vld [vmem:[%s1916_s1 + $0x38] sm:$0xff]  ;;  %v1117_v49 = vld [vmem:[%s1916_s1 + $0xc0] sm:$0xff]  ;;  %s1902_s6 = scalar_lea.vmem %s1919_s4, %s1191_s29 }
  0x10   : > { %s1682_s24 = scalar_lea.vmem %s1915_s0, %s1584_s17  ;;  %v1118_v50 = vld [vmem:[%s1916_s1 + $0xc8] sm:$0xff]  ;;  %v1476_v51 = vpack.c.bf16 %v207_v48, %v206_v47  ;;  %v208_v53 = vld [vmem:[%s1916_s1 + $0x40] sm:$0xff]  ;;  %v1119_v54 = vld [vmem:[%s1916_s1 + $0xd0] sm:$0xff] }
  0x11   : > { %v1691_v22 = vld [vmem:[%s1682_s24 + $0x1] sm:$0xff]  ;;  %1459 = vmatpush3.bf16.msra.mxu0 %v1456_v16  ;;  %v1728_v37 = vld [vmem:[%s1682_s24 + $0x9] sm:$0xff]  ;;  %v1508_v52 = vpack.c.bf16 %v1118_v50, %v1117_v49  ;;  %v1172_v57 = vld [vmem:[%s1916_s1 + $0x1f8] sm:$0xff] }
  0x12   : > { %1298 = vmatprep.mubr.msk.f32.mxu0 %vm221_vm0, %v1691_v22  ;;  %1340 = vmatprep.mubr.msk.f32.mxu1 %vm221_vm0, %v1691_v22  ;;  %v198_v44 = vld [vmem:[%s1682_s24] sm:$0xff]  ;;  %v1146_v55 = vld [vmem:[%s1916_s1 + $0x168] sm:$0xff]  ;;  %v1147_v56 = vld [vmem:[%s1916_s1 + $0x170] sm:$0xff] }
  0x13   : > { %1491 = vmatpush3.bf16.msra.mxu1 %v1488_v17  ;;  %1461 = vmatprep.subr.bf16.mxu0 %v1460_v23  ;;  %v1173_v58 = vld [vmem:[%s1916_s1 + $0x200] sm:$0xff]  ;;  %v1148_v59 = vld [vmem:[%s1916_s1 + $0x178] sm:$0xff]  ;;  %v199_v61 = vld [vmem:[%s1682_s24 + $0x8] sm:$0xff]  ;;  %v1512_v62 = vpack.c.bf16 %v1147_v56, %v1146_v55 }
  0x14   : > { %1493 = vmatprep.subr.bf16.mxu1 %v1492_v24  ;;  %v1149_v60 = vld [vmem:[%s1916_s1 + $0x180] sm:$0xff]  ;;  %v1174_v63 = vld [vmem:[%s1916_s1 + $0x208] sm:$0xff]  ;;  %v1175_v0 = vld [vmem:[%s1916_s1 + $0x210] sm:$0xff]  ;;  %v1544_v1 = vpack.c.bf16 %v1173_v58, %v1172_v57 }
  0x15   : > { %1463 = vmatpush3.bf16.msra.mxu0 %v1460_v23  ;;  %v1516_v2 = vpack.c.bf16 %v1149_v60, %v1148_v59  ;;  %v1548_v3 = vpack.c.bf16 %v1175_v0, %v1174_v63  ;;  %v1150_v4 = vld [vmem:[%s1916_s1 + $0x188] sm:$0xff]  ;;  %v1151_v5 = vld [vmem:[%s1916_s1 + $0x190] sm:$0xff]  ;;  %v1176_v6 = vld [vmem:[%s1916_s1 + $0x218] sm:$0xff] }
  0x16   : > { %1296 = vmatprep.subr.mxu0 %v1104_v25  ;;  %v1177_v7 = vld [vmem:[%s1916_s1 + $0x220] sm:$0xff]  ;;  %v1520_v9 = vpack.c.bf16 %v1151_v5, %v1150_v4  ;;  %v1152_v11 = vld [vmem:[%s1916_s1 + $0x198] sm:$0xff]  ;;  %v1178_v13 = vld [vmem:[%s1916_s1 + $0x228] sm:$0xff] }
  0x17   : > { %1495 = vmatpush3.bf16.msra.mxu1 %v1492_v24  ;;  %v627_v8 = vld [vmem:[%s1682_s24 + $0x2] sm:$0xff]  ;;  %v1552_v10 = vpack.c.bf16 %v1177_v7, %v1176_v6  ;;  %v1179_v14 = vld [vmem:[%s1916_s1 + $0x230] sm:$0xff]  ;;  %v1180_v20 = vld [vmem:[%s1916_s1 + $0x238] sm:$0xff] }
  0x18   : > { %1338 = vmatprep.subr.mxu1 %v1128_v28  ;;  %v1153_v12 = vld [vmem:[%s1916_s1 + $0x1a0] sm:$0xff]  ;;  %v1556_v16 = vpack.c.bf16 %v1179_v14, %v1178_v13  ;;  %v1154_v17 = vld [vmem:[%s1916_s1 + $0x1a8] sm:$0xff]  ;;  %v1163_v21 = vld [vmem:[%s1916_s1 + $0x1b0] sm:$0xff] }
  0x19   : > { %1297 = vmatpush3.msra.mxu0 %v1104_v25  ;;  %v1524_v15 = vpack.c.bf16 %v1153_v12, %v1152_v11  ;;  %v1137_v18 = vld [vmem:[%s1916_s1 + $0x120] sm:$0xff]  ;;  %v1138_v19 = vld [vmem:[%s1916_s1 + $0x128] sm:$0xff]  ;;  %v1164_v23 = vld [vmem:[%s1916_s1 + $0x1b8] sm:$0xff] }
  0x1a   : > { %1465 = vmatprep.subr.bf16.mxu0 %v1464_v31  ;;  %1299 = vmatmul.mubr.msk.f32.vlgmr.msra.gmra.mrb[0].mxu0 %vm221_vm0, %v1728_v37  ;;  %v1528_v24 = vpack.c.bf16 %v1138_v19, %v1137_v18  ;;  %v1139_v25 = vld [vmem:[%s1916_s1 + $0x130] sm:$0xff]  ;;  %v1140_v26 = vld [vmem:[%s1916_s1 + $0x138] sm:$0xff]  ;;  %v1560_v27 = vpack.c.bf16 %v1164_v23, %v1163_v21  ;;  %v1166_v29 = vld [vmem:[%s1916_s1 + $0x1c8] sm:$0xff] }
  0x1b   : > { %1339 = vmatpush3.msra.mxu1 %v1128_v28  ;;  %1467 = vmatpush3.bf16.msra.mxu0 %v1464_v31  ;;  %v1165_v28 = vld [vmem:[%s1916_s1 + $0x1c0] sm:$0xff]  ;;  %v628_v30 = vld [vmem:[%s1682_s24 + $0xa] sm:$0xff]  ;;  %v1532_v31 = vpack.c.bf16 %v1140_v26, %v1139_v25  ;;  %v1168_v36 = vld [vmem:[%s1916_s1 + $0x1d8] sm:$0xff] }
  0x1c   : > { %1497 = vmatprep.subr.bf16.mxu1 %v1496_v34  ;;  %1341 = vmatmul.mubr.msk.f32.vlgmr.msra.gmra.mrb[0].mxu1 %vm221_vm0, %v1728_v37  ;;  %v1564_v32 = vpack.c.bf16 %v1166_v29, %v1165_v28  ;;  %v1141_v33 = vld [vmem:[%s1916_s1 + $0x140] sm:$0xff]  ;;  %v1167_v35 = vld [vmem:[%s1916_s1 + $0x1d0] sm:$0xff]  ;;  %v1144_v41 = vld [vmem:[%s1916_s1 + $0x158] sm:$0xff] }
  0x1d   : > { %1499 = vmatpush3.bf16.msra.mxu1 %v1496_v34  ;;  %1469 = vmatprep.subr.bf16.mxu0 %v1468_v38  ;;  %v1142_v34 = vld [vmem:[%s1916_s1 + $0x148] sm:$0xff]  ;;  %v1143_v40 = vld [vmem:[%s1916_s1 + $0x150] sm:$0xff]  ;;  %v1169_v42 = vld [vmem:[%s1916_s1 + $0x1e0] sm:$0xff] }
  0x1e   : > { %1501 = vmatprep.subr.bf16.mxu1 %v1500_v39  ;;  %1319 = vmatprep.mubr.msk.f32.mxu0 %vm221_vm0, %v198_v44  ;;  %v1170_v43 = vld [vmem:[%s1916_s1 + $0x1e8] sm:$0xff]  ;;  %v1171_v47 = vld [vmem:[%s1916_s1 + $0x1f0] sm:$0xff]  ;;  %v1110_v49 = vld [vmem:[%s1918_s3] ss:$0 sm:$0xff] }
  0x1f   : > { %1361 = vmatprep.mubr.msk.f32.mxu1 %vm221_vm0, %v198_v44  ;;  %1471 = vmatpush3.bf16.msra.mxu0 %v1468_v38  ;;  %v1536_v38 = vpack.c.bf16 %v1142_v34, %v1141_v33  ;;  %v1540_v44 = vpack.c.bf16 %v1144_v41, %v1143_v40 }
  0x20   : > { %1473 = vmatprep.subr.bf16.mxu0 %v1472_v45 }
  0x21   : > { %1503 = vmatpush3.bf16.msra.mxu1 %v1500_v39  ;;  %v1568_v39 = vpack.c.bf16 %v1168_v36, %v1167_v35 }
  0x22   : > { %1505 = vmatprep.subr.bf16.mxu1 %v1504_v46 }
  0x23   : > { %1475 = vmatpush3.bf16.msra.mxu0 %v1472_v45  ;;  %v1572_v45 = vpack.c.bf16 %v1170_v43, %v1169_v42 }
  0x24   : > { %1477 = vmatprep.subr.bf16.mxu0 %v1476_v51 }
  0x25   : > { %1507 = vmatpush3.bf16.msra.mxu1 %v1504_v46  ;;  %v1145_v46 = vld [vmem:[%s1916_s1 + $0x160] sm:$0xff] }
  0x26   : > { %1509 = vmatprep.subr.bf16.mxu1 %v1508_v52 }
  0x27   : > { %1479 = vmatpush3.bf16.msra.mxu0 %v1476_v51 }
  0x28   : > { %1317 = vmatprep.subr.mxu0 %v208_v53 }
  0x29   : > { %1511 = vmatpush3.bf16.msra.mxu1 %v1508_v52 }
  0x2a   : > { %1359 = vmatprep.subr.mxu1 %v1119_v54 }
  0x2b   : > { %1318 = vmatpush3.msra.mxu0 %v208_v53 }
  0x2c   : > { %1320 = vmatmul.mubr.msk.f32.vlgmr.msra.gmra.mrb[0].mxu0 %vm221_vm0, %v199_v61  ;;  %1513 = vmatprep.subr.bf16.mxu0 %v1512_v62 }
  0x2d   : > { %1360 = vmatpush3.msra.mxu1 %v1119_v54  ;;  %1515 = vmatpush3.bf16.msra.mxu0 %v1512_v62 }
  0x2e   : > { %1362 = vmatmul.mubr.msk.f32.vlgmr.msra.gmra.mrb[0].mxu1 %vm221_vm0, %v199_v61  ;;  %1545 = vmatprep.subr.bf16.mxu1 %v1544_v1 }
  0x2f   : > { %1547 = vmatpush3.bf16.msra.mxu1 %v1544_v1  ;;  %1517 = vmatprep.subr.bf16.mxu0 %v1516_v2 }
  0x30   : > { %1549 = vmatprep.subr.bf16.mxu1 %v1548_v3  ;;  %1382 = vmatprep.mubr.msk.f32.mxu0 %vm221_vm0, %v627_v8 }
  0x31   : > { %1424 = vmatprep.mubr.msk.f32.mxu1 %vm221_vm0, %v627_v8  ;;  %1519 = vmatpush3.bf16.msra.mxu0 %v1516_v2 }
  0x32   : > { %1521 = vmatprep.subr.bf16.mxu0 %v1520_v9 }
  0x33   : > { %1551 = vmatpush3.bf16.msra.mxu1 %v1548_v3 }
  0x34   : > { %1553 = vmatprep.subr.bf16.mxu1 %v1552_v10 }
  0x35   : > { %1523 = vmatpush3.bf16.msra.mxu0 %v1520_v9 }
  0x36   : > { %1525 = vmatprep.subr.bf16.mxu0 %v1524_v15 }
  0x37   : > { %1555 = vmatpush3.bf16.msra.mxu1 %v1552_v10 }
  0x38   : > { %1557 = vmatprep.subr.bf16.mxu1 %v1556_v16 }
  0x39   : > { %1527 = vmatpush3.bf16.msra.mxu0 %v1524_v15 }
  0x3a   : > { %1380 = vmatprep.subr.mxu0 %v1154_v17 }
  0x3b   : > { %1559 = vmatpush3.bf16.msra.mxu1 %v1556_v16 }
  0x3c   : > { %1422 = vmatprep.subr.mxu1 %v1180_v20 }
  0x3d   : > { %1381 = vmatpush3.msra.mxu0 %v1154_v17 }
  0x3e   : > { %1529 = vmatprep.subr.bf16.mxu0 %v1528_v24  ;;  %1383 = vmatmul.mubr.msk.f32.vlgmr.msra.gmra.mrb[2].mxu0 %vm221_vm0, %v628_v30 }
  0x3f   : > { %1423 = vmatpush3.msra.mxu1 %v1180_v20  ;;  %1531 = vmatpush3.bf16.msra.mxu0 %v1528_v24 }
  0x40   : > { %1561 = vmatprep.subr.bf16.mxu1 %v1560_v27  ;;  %1425 = vmatmul.mubr.msk.f32.vlgmr.msra.gmra.mrb[2].mxu1 %vm221_vm0, %v628_v30 }
  0x41   : > { %1563 = vmatpush3.bf16.msra.mxu1 %v1560_v27  ;;  %1533 = vmatprep.subr.bf16.mxu0 %v1532_v31 }
  0x42   : > { %1565 = vmatprep.subr.bf16.mxu1 %v1564_v32  ;;  %1403 = vmatprep.mubr.msk.f32.mxu0 %vm221_vm0, %v1691_v22 }
  0x43   : > { %1445 = vmatprep.mubr.msk.f32.mxu1 %vm221_vm0, %v1691_v22  ;;  %1535 = vmatpush3.bf16.msra.mxu0 %v1532_v31  ;;  %v1109_v22 = vld [vmem:[%s1917_s2] ss:$0 sm:$0xff] }
  0x44   : > { %1537 = vmatprep.subr.bf16.mxu0 %v1536_v38 }
  0x45   : > { %1567 = vmatpush3.bf16.msra.mxu1 %v1564_v32 }
  0x46   : > { %1569 = vmatprep.subr.bf16.mxu1 %v1568_v39 }
  0x47   : > { %1539 = vmatpush3.bf16.msra.mxu0 %v1536_v38 }
  0x48   : > { %1541 = vmatprep.subr.bf16.mxu0 %v1540_v44 }
  0x49   : > { %1571 = vmatpush3.bf16.msra.mxu1 %v1568_v39 }
  0x4a   : > { %1573 = vmatprep.subr.bf16.mxu1 %v1572_v45 }
  0x4b   : > { %1543 = vmatpush3.bf16.msra.mxu0 %v1540_v44 }
  0x4c   : > { %1401 = vmatprep.subr.mxu0 %v1145_v46 }
  0x4d   : > { %1575 = vmatpush3.bf16.msra.mxu1 %v1572_v45 }
  0x4e   : > { %1443 = vmatprep.subr.mxu1 %v1171_v47 }
  0x4f   : > { %1402 = vmatpush3.msra.mxu0 %v1145_v46 }
  0x50   : > { %1404 = vmatmul.mubr.msk.f32.vlgmr.msra.gmra.mrb[2].mxu0 %vm221_vm0, %v1728_v37 }
  0x51   : > { %1444 = vmatpush3.msra.mxu1 %v1171_v47 }
  0x52   : > { %1446 = vmatmul.mubr.msk.f32.vlgmr.msra.gmra.mrb[2].mxu1 %vm221_vm0, %v1728_v37 }
  0xff   : > { %v1321_v48 = vpop.f32.mrb[0].mxu0 }
 0x100   : > { %v392_v50 = vmul.f32 %v1321_v48, %v1109_v22  ;;  %v375_v52 = vpop.f32.mrb[1].mxu0 }
 0x101   : > { %v1363_v51 = vpop.f32.mrb[0].mxu1  ;;  %v391_v54 = vmul.f32 %v1109_v22, %v375_v52 }
 0x102   : > { %v600_v53 = vmul.f32 %v1363_v51, %v1109_v22  ;;  %v583_v55 = vpop.f32.mrb[1].mxu1  ;;  %v401_v56 = vadd.f32 %v1110_v49, %v392_v50 }
 0x103   : > { %v599_v57 = vmul.f32 %v1109_v22, %v583_v55  ;;  %v400_v58 = vadd.f32 %v1110_v49, %v391_v54 }
 0x104   : > { %v609_v37 = vadd.f32 %v1110_v49, %v600_v53  ;;  %v403_v59 = vmax.f32 %v401_v56, 0.0 }
 0x105   : > { %v608_v60 = vadd.f32 %v1110_v49, %v599_v57  ;;  %v402_v62 = vmax.f32 %v400_v58, 0.0 }
 0x106   : > { %v611_v61 = vmax.f32 %v609_v37, 0.0  ;;  %405 = vst [vmem:[%s1902_s6 + $0x8] sm:$0xff] %v403_v59 }
 0x107   : > { %v610_v63 = vmax.f32 %v608_v60, 0.0  ;;  %404 = vst [vmem:[%s1902_s6] sm:$0xff] %v402_v62 }
 0x108   : > { %1136 = vst [vmem:[%s1902_s6 + $0x18] sm:$0xff] %v611_v61 }
 0x109   : > { %1135 = vst [vmem:[%s1902_s6 + $0x10] sm:$0xff] %v610_v63 }
 0x123   : > { %v1405_v0 = vpop.f32.mrb[2].mxu0 }
 0x124   : > { %v809_v1 = vmul.f32 %v1405_v0, %v1109_v22  ;;  %v792_v3 = vpop.f32.mrb[3].mxu0 }
 0x125   : > { %v1447_v2 = vpop.f32.mrb[2].mxu1  ;;  %v808_v5 = vmul.f32 %v1109_v22, %v792_v3 }
 0x126   : > { %v1018_v4 = vmul.f32 %v1447_v2, %v1109_v22  ;;  %v1001_v6 = vpop.f32.mrb[3].mxu1  ;;  %v818_v7 = vadd.f32 %v1110_v49, %v809_v1 }
 0x127   : > { %v1017_v8 = vmul.f32 %v1109_v22, %v1001_v6  ;;  %v817_v10 = vadd.f32 %v1110_v49, %v808_v5 }
 0x128   : > { %v1027_v9 = vadd.f32 %v1110_v49, %v1018_v4  ;;  %v820_v11 = vmax.f32 %v818_v7, 0.0 }
 0x129   : > { %v1026_v12 = vadd.f32 %v1110_v49, %v1017_v8  ;;  %v819_v14 = vmax.f32 %v817_v10, 0.0 }
 0x12a   : > { %v1029_v13 = vmax.f32 %v1027_v9, 0.0  ;;  %1162 = vst [vmem:[%s1902_s6 + $0x28] sm:$0xff] %v820_v11 }
 0x12b   : > { %v1028_v15 = vmax.f32 %v1026_v12, 0.0  ;;  %1161 = vst [vmem:[%s1902_s6 + $0x20] sm:$0xff] %v819_v14 }
 0x12c   : > { %1188 = vst [vmem:[%s1902_s6 + $0x38] sm:$0xff] %v1029_v13 }
 0x12d   : > { %1187 = vst [vmem:[%s1902_s6 + $0x30] sm:$0xff] %v1028_v15 }
 0x12e PF: > { %s14_s15 = sadd.s32 1, %s1599_s15  }
 0x12f   : > { %p11_p4 = scmp.ge.s32.totalorder %s14_s15, 4  }
 0x131   :  { %13 = sbr.rel (!%p11_p4) target bundleno = 1 (0x1), region = 76 }

</bundles_post_ra>
